<compile_context>
chip_gen: v6e
topology: v6e:2x2x1
jax: 0.10.0
libtpu: 0.0.40
codegen_flags: <defaults>
</compile_context>

<pallas_src>
import functools

import numpy as np
import jax
import jax.numpy as jnp
from jax.experimental import pallas as pl
from jax.experimental.pallas import tpu as pltpu

EPS = 1e-5
# Safe on every generation (v7x physical VMEM is 64 MiB per TC); raise towards
# ~96 MiB on v5e/v6e (128 MiB physical) when row-tiling large images.
VMEM_LIMIT_BYTES = 48 * 1024 * 1024


# ----------------------------- Pallas kernels ------------------------------------


def _conv_kernel(*refs, pool_input, hp, wp, c_in):
    # pool_input=True : x (1,H,Wp,2Cin) f32 regrouped NHWC image (2x2 max fused)
    # pool_input=False: src (1,R,Cs) bf16 raw prev-conv | aff (2,Cs) f32 BN1 affine
    # common inputs   : w (9Cs,Cd) bf16 tap-major | mask (R,2) f32 wrap masks
    # outputs         : raw conv (1,R,Cd) bf16 | per-image stats (1,2,Cd) f32
    # scratch         : pad (R+2P,Cs) f32 | tap (R,9Cs) bf16
    if pool_input:
        x_ref, w_ref, mask_ref, out_ref, stats_ref, pad_ref, tap_ref = refs
    else:
        src_ref, aff_ref, w_ref, mask_ref, out_ref, stats_ref, pad_ref, tap_ref = refs

    r = hp * wp
    p = wp + 1                      # zero rows of flat padding at each end
    cs = c_in

    if pool_input:
        # 2x2 max-pool fused from the regrouped NHWC block.
        a = x_ref[0, :, :, 0:cs]                        # even-x pixels (H,Wp,Cin)
        b = x_ref[0, :, :, cs:2 * cs]                   # odd-x pixels
        m = jnp.maximum(a, b).reshape(hp, 2, wp, cs)    # leading-dim split of H
        src = jnp.maximum(m[:, 0], m[:, 1]).reshape(r, cs)      # (R, Cin) f32
    else:
        # BN affine + ReLU of the previous conv, applied on the fly (f32 math).
        src = src_ref[0].astype(jnp.float32)
        src = jnp.maximum(src * aff_ref[0:1, :] + aff_ref[1:2, :], 0.0)

    # Zero-padded, row-flattened source: vertical conv padding comes for free.
    zpad = jnp.zeros((p, cs), jnp.float32)
    pad_ref[0:p, :] = zpad
    pad_ref[p + r:p + r + p, :] = zpad
    pad_ref[p:p + r, :] = src

    # Horizontal-wrap masks, broadcast once (hoisted) and applied to the
    # (R, Cs) operand; only dx==0 / dx==2 taps can wrap across the W boundary.
    m_dx0 = jnp.broadcast_to(mask_ref[:, 0:1], (r, cs))
    m_dx2 = jnp.broadcast_to(mask_ref[:, 1:2], (r, cs))

    # Stage the 9 shifted taps as one (R, 9*Cs) bf16 matrix in VMEM scratch.
    for dy in range(3):
        for dx in range(3):
            t = dy * 3 + dx
            off = dy * wp + dx
            tap = pad_ref[off:off + r, :]               # (R, Cs) f32
            if dx == 0:
                tap = tap * m_dx0
            elif dx == 2:
                tap = tap * m_dx2
            tap_ref[:, t * cs:(t + 1) * cs] = tap.astype(jnp.bfloat16)

    # Single deep matmul on the MXU: (R, 9Cs) @ (9Cs, Cd), f32 accumulation.
    acc = jnp.dot(tap_ref[...], w_ref[...], preferred_element_type=jnp.float32)

    out_ref[0] = acc.astype(out_ref.dtype)              # bf16 intermediate
    stats_ref[0, 0:1, :] = jnp.sum(acc, axis=0, keepdims=True)        # sum
    stats_ref[0, 1:2, :] = jnp.sum(acc * acc, axis=0, keepdims=True)  # sum of sq


def _bn_relu_kernel(src_ref, aff_ref, o_ref):
    # Final BN2 affine + ReLU (pure VPU, f32 math, parallel grid).
    y = src_ref[0].astype(jnp.float32) * aff_ref[0:1, :] + aff_ref[1:2, :]
    o_ref[0] = jnp.maximum(y, 0.0).astype(o_ref.dtype)


# ----------------------------- wrappers -------------------------------------------


def _conv_call(src, w_taps, mask, aff_in, *, hp, wp, c_in, pool_input):
    n = src.shape[0]
    cs = c_in
    cd = w_taps.shape[1]
    r = hp * wp
    p = wp + 1
    rpad = r + 2 * p

    kernel = functools.partial(_conv_kernel, pool_input=pool_input,
                               hp=hp, wp=wp, c_in=c_in)

    if pool_input:
        h = 2 * hp
        in_specs = [pl.BlockSpec((1, h, wp, 2 * cs), lambda i: (i, 0, 0, 0))]
        args = [src]
    else:
        in_specs = [pl.BlockSpec((1, r, cs), lambda i: (i, 0, 0)),
                    pl.BlockSpec((2, cs), lambda i: (0, 0))]
        args = [src, aff_in]
    in_specs += [pl.BlockSpec((9 * cs, cd), lambda i: (0, 0)),
                 pl.BlockSpec((r, 2), lambda i: (0, 0))]
    args += [w_taps, mask]

    out_raw, stats = pl.pallas_call(
        kernel,
        grid=(n,),
        in_specs=in_specs,
        out_specs=(
            pl.BlockSpec((1, r, cd), lambda i: (i, 0, 0)),
            pl.BlockSpec((1, 2, cd), lambda i: (i, 0, 0)),   # per-image stats
        ),
        out_shape=(
            jax.ShapeDtypeStruct((n, r, cd), jnp.bfloat16),
            jax.ShapeDtypeStruct((n, 2, cd), jnp.float32),
        ),
        scratch_shapes=[pltpu.VMEM((rpad, cs), jnp.float32),
                        pltpu.VMEM((r, 9 * cs), jnp.bfloat16)],
        compiler_params=pltpu.CompilerParams(
            dimension_semantics=("parallel",),       # no resident accumulator
            vmem_limit_bytes=VMEM_LIMIT_BYTES,
        ),
    )(*args)
    return out_raw, stats


def _bn_relu_call(src_flat, aff):
    n, r, c = src_flat.shape
    return pl.pallas_call(
        _bn_relu_kernel,
        grid=(n,),
        in_specs=[
            pl.BlockSpec((1, r, c), lambda i: (i, 0, 0)),
            pl.BlockSpec((2, c), lambda i: (0, 0)),
        ],
        out_specs=pl.BlockSpec((1, r, c), lambda i: (i, 0, 0)),
        out_shape=jax.ShapeDtypeStruct((n, r, c), jnp.float32),
        compiler_params=pltpu.CompilerParams(
            dimension_semantics=("parallel",),
            vmem_limit_bytes=VMEM_LIMIT_BYTES,
        ),
    )(src_flat, aff)


def _fold_bn(stats, gamma, beta, count):
    # stats: (N, 2, Cd) per-image [sum; sum-of-squares] from the f32 conv acc.
    s = jnp.sum(stats, axis=0)                            # (2, Cd)
    mean = s[0] / count
    var = s[1] / count - mean * mean                      # biased variance
    scale = gamma * jax.lax.rsqrt(var + EPS)
    shift = beta - mean * scale
    return jnp.stack([scale, shift]).astype(jnp.float32)  # (2, Cd)


def _wrap_masks(hp, wp):
    # col 0: zero where out x==0    (kills dx==0 taps that wrap to previous row)
    # col 1: zero where out x==wp-1 (kills dx==2 taps that wrap to next row)
    x = np.tile(np.arange(wp), hp)
    m_dx0 = (x != 0).astype(np.float32)
    m_dx2 = (x != wp - 1).astype(np.float32)
    return jnp.asarray(np.stack([m_dx0, m_dx2], axis=1))   # (R, 2)


def _oihw_to_taps(w_oihw):
    # PyTorch conv weight (Cout, Cin, 3, 3) -> (9*Cin, Cout), row = (dy*3+dx)*Cin + ci
    co, ci, kh, kw = w_oihw.shape
    return jnp.transpose(w_oihw, (2, 3, 1, 0)).reshape(kh * kw * ci, co)


def init_down_params(key, in_channel, out_channel):
    mid_channel = out_channel  # DoubleConv default
    k1, k2 = jax.random.split(key)
    return dict(
        w1=0.1 * jax.random.normal(k1, (mid_channel, in_channel, 3, 3), jnp.float32),
        g1=1.0 + 0.05 * jnp.arange(mid_channel, dtype=jnp.float32),
        b1=0.02 * jnp.arange(mid_channel, dtype=jnp.float32) - 0.03,
        w2=0.1 * jax.random.normal(k2, (out_channel, mid_channel, 3, 3), jnp.float32),
        g2=1.0 - 0.04 * jnp.arange(out_channel, dtype=jnp.float32),
        b2=0.01 * jnp.arange(out_channel, dtype=jnp.float32),
    )


def down_forward_nhwc(x_nhwc, params):
    """Native NHWC entry point (no layout transposes)."""
    n, h, w, c_in = x_nhwc.shape
    assert h % 2 == 0 and w % 2 == 0, "MaxPool2d(2,2) path assumes even H, W"
    hp, wp = h // 2, w // 2
    r = hp * wp

    xr = x_nhwc.reshape(n, h, wp, 2 * c_in)          # free row-major regrouping
    mask = _wrap_masks(hp, wp)                       # (R, 2)
    w1 = _oihw_to_taps(params["w1"]).astype(jnp.bfloat16)   # (9*Cin,  Cmid)
    w2 = _oihw_to_taps(params["w2"]).astype(jnp.bfloat16)   # (9*Cmid, Cout)

    conv1_raw, stats1 = _conv_call(xr, w1, mask, None,
                                   hp=hp, wp=wp, c_in=c_in, pool_input=True)
    aff1 = _fold_bn(stats1, params["g1"], params["b1"], n * r)

    c_mid = conv1_raw.shape[-1]
    conv2_raw, stats2 = _conv_call(conv1_raw, w2, mask, aff1,
                                   hp=hp, wp=wp, c_in=c_mid, pool_input=False)
    aff2 = _fold_bn(stats2, params["g2"], params["b2"], n * r)

    out_flat = _bn_relu_call(conv2_raw, aff2)        # (N, R, Cout) f32
    return out_flat.reshape(n, hp, wp, out_flat.shape[-1])


@jax.jit
def down_forward(x_nchw, params):
    # NCHW compatibility wrapper (PyTorch layout).  Production callers should
    # prefer down_forward_nhwc and skip both transposes.
    x = jnp.transpose(x_nchw, (0, 2, 3, 1)).astype(jnp.float32)   # NCHW -> NHWC
    y = down_forward_nhwc(x, params)
    return jnp.transpose(y, (0, 3, 1, 2))                         # NHWC -> NCHW


# ----------------------------- pure-JAX reference ----------------------------------


def _ref_down(x, params):
    xp = jax.lax.reduce_window(
        x, -jnp.inf, jax.lax.max, (1, 1, 2, 2), (1, 1, 2, 2), "VALID"
    )

    def cbr(y, w, g, b):
        z = jax.lax.conv_general_dilated(
            y, w, window_strides=(1, 1), padding=((1, 1), (1, 1)),
            dimension_numbers=("NCHW", "OIHW", "NCHW"),
            precision=jax.lax.Precision.HIGHEST,
        )
        mean = jnp.mean(z, axis=(0, 2, 3), keepdims=True)
        var = jnp.mean((z - mean) ** 2, axis=(0, 2, 3), keepdims=True)
        zn = (z - mean) * jax.lax.rsqrt(var + EPS)
        zn = zn * g.reshape(1, -1, 1, 1) + b.reshape(1, -1, 1, 1)
        return jnp.maximum(zn, 0.0)

    h = cbr(xp, params["w1"], params["g1"], params["b1"])
    return cbr(h, params["w2"], params["g2"], params["b2"])


# ----------------------------- main -------------------------------------------------

if __name__ == "__main__":
    key = jax.random.PRNGKey(0)
    kx, kp = jax.random.split(key)

    N, C_IN, H, W = 2, 4, 16, 16
    C_OUT = 8

    x = jax.random.normal(kx, (N, C_IN, H, W), jnp.float32)
    params = init_down_params(kp, C_IN, C_OUT)

    out = jax.block_until_ready(down_forward(x, params))
    assert out.shape == (N, C_OUT, H // 2, W // 2), out.shape

    ref = _ref_down(x, params)
    max_err = float(jnp.max(jnp.abs(out - ref)))
    assert jnp.allclose(out, ref, atol=2e-2, rtol=2e-2), max_err

    print("KERNEL_OK")
</pallas_src>

<mosaic_0001>
module attributes {stable_mosaic.version = 11 : i64} {
  func.func @_conv_kernel(%arg0: i32, %arg1: memref<1x64x8xbf16, #tpu.memory_space<vmem>>, %arg2: memref<2x8xf32, #tpu.memory_space<vmem>>, %arg3: memref<72x8xbf16, #tpu.memory_space<vmem>>, %arg4: memref<64x2xf32, #tpu.memory_space<vmem>>, %arg5: memref<1x64x8xbf16, #tpu.memory_space<vmem>>, %arg6: memref<1x2x8xf32, #tpu.memory_space<vmem>>, %arg7: memref<82x8xf32, #tpu.memory_space<vmem>>, %arg8: memref<64x72xbf16, #tpu.memory_space<vmem>>) attributes {dimension_semantics = [#tpu.dimension_semantics<parallel>], iteration_bounds = array<i64: 2>, scalar_prefetch = 0 : i64, scratch_operands = 2 : i64, tpu.core_type = #tpu.core_type<tc>, window_params = [{transform_indices = @transform_0, window_bounds = array<i64: 1, 64, 8>}, {pipeline_mode = #tpu.pipeline_mode<synchronous>, transform_indices = @transform_1, window_bounds = array<i64: 2, 8>}, {pipeline_mode = #tpu.pipeline_mode<synchronous>, transform_indices = @transform_2, window_bounds = array<i64: 72, 8>}, {pipeline_mode = #tpu.pipeline_mode<synchronous>, transform_indices = @transform_3, window_bounds = array<i64: 64, 2>}, {transform_indices = @transform_4, window_bounds = array<i64: 1, 64, 8>}, {transform_indices = @transform_5, window_bounds = array<i64: 1, 2, 8>}]} {
    %c0 = arith.constant 0 : index
    %c0_0 = arith.constant 0 : index
    %c0_1 = arith.constant 0 : index
    %0 = vector.load %arg1[%c0, %c0_0, %c0_1] : memref<1x64x8xbf16, #tpu.memory_space<vmem>>, vector<1x64x8xbf16>
    %1 = vector.shape_cast %0 : vector<1x64x8xbf16> to vector<64x8xbf16>
    %2 = arith.extf %1 : vector<64x8xbf16> to vector<64x8xf32>
    %c0_2 = arith.constant 0 : index
    %c0_3 = arith.constant 0 : index
    %3 = vector.load %arg2[%c0_2, %c0_3] : memref<2x8xf32, #tpu.memory_space<vmem>>, vector<1x8xf32>
    %4 = vector.broadcast %3 : vector<1x8xf32> to vector<64x8xf32>
    %5 = arith.mulf %2, %4 : vector<64x8xf32>
    %c1 = arith.constant 1 : index
    %c0_4 = arith.constant 0 : index
    %6 = vector.load %arg2[%c1, %c0_4] : memref<2x8xf32, #tpu.memory_space<vmem>>, vector<1x8xf32>
    %7 = vector.broadcast %6 : vector<1x8xf32> to vector<64x8xf32>
    %8 = arith.addf %5, %7 : vector<64x8xf32>
    %cst = arith.constant 0.000000e+00 : f32
    %9 = vector.broadcast %cst : f32 to vector<64x8xf32>
    %10 = arith.maximumf %8, %9 : vector<64x8xf32>
    %cst_5 = arith.constant 0.000000e+00 : f32
    %11 = vector.broadcast %cst_5 : f32 to vector<9x8xf32>
    %c0_6 = arith.constant 0 : index
    %c0_7 = arith.constant 0 : index
    %12 = vector.load %arg7[%c0_6, %c0_7] : memref<82x8xf32, #tpu.memory_space<vmem>>, vector<9x8xf32>
    tpu.vector_store %arg7[%c0_6, %c0_7], %11 {strides = array<i32>} : memref<82x8xf32, #tpu.memory_space<vmem>>, vector<9x8xf32>,
    %c73 = arith.constant 73 : index
    %c0_8 = arith.constant 0 : index
    %13 = vector.load %arg7[%c73, %c0_8] : memref<82x8xf32, #tpu.memory_space<vmem>>, vector<9x8xf32>
    tpu.vector_store %arg7[%c73, %c0_8], %11 {strides = array<i32>} : memref<82x8xf32, #tpu.memory_space<vmem>>, vector<9x8xf32>,
    %c9 = arith.constant 9 : index
    %c0_9 = arith.constant 0 : index
    %14 = vector.load %arg7[%c9, %c0_9] : memref<82x8xf32, #tpu.memory_space<vmem>>, vector<64x8xf32>
    tpu.vector_store %arg7[%c9, %c0_9], %10 {strides = array<i32>} : memref<82x8xf32, #tpu.memory_space<vmem>>, vector<64x8xf32>,
    %c0_10 = arith.constant 0 : index
    %c0_11 = arith.constant 0 : index
    %15 = vector.load %arg4[%c0_10, %c0_11] : memref<64x2xf32, #tpu.memory_space<vmem>>, vector<64x1xf32>
    %16 = vector.shape_cast %15 : vector<64x1xf32> to vector<64x1xf32>
    %17 = vector.broadcast %16 : vector<64x1xf32> to vector<64x8xf32>
    %c0_12 = arith.constant 0 : index
    %c1_13 = arith.constant 1 : index
    %18 = vector.load %arg4[%c0_12, %c1_13] : memref<64x2xf32, #tpu.memory_space<vmem>>, vector<64x1xf32>
    %19 = vector.shape_cast %18 : vector<64x1xf32> to vector<64x1xf32>
    %20 = vector.broadcast %19 : vector<64x1xf32> to vector<64x8xf32>
    %c0_14 = arith.constant 0 : index
    %c0_15 = arith.constant 0 : index
    %21 = vector.load %arg7[%c0_14, %c0_15] : memref<82x8xf32, #tpu.memory_space<vmem>>, vector<64x8xf32>
    %22 = arith.mulf %21, %17 : vector<64x8xf32>
    %23 = arith.truncf %22 : vector<64x8xf32> to vector<64x8xbf16>
    %c0_16 = arith.constant 0 : index
    %c0_17 = arith.constant 0 : index
    %24 = vector.load %arg8[%c0_16, %c0_17] : memref<64x72xbf16, #tpu.memory_space<vmem>>, vector<64x8xbf16>
    tpu.vector_store %arg8[%c0_16, %c0_17], %23 {strides = array<i32>} : memref<64x72xbf16, #tpu.memory_space<vmem>>, vector<64x8xbf16>,
    %c1_18 = arith.constant 1 : index
    %c0_19 = arith.constant 0 : index
    %25 = vector.load %arg7[%c1_18, %c0_19] : memref<82x8xf32, #tpu.memory_space<vmem>>, vector<64x8xf32>
    %26 = arith.truncf %25 : vector<64x8xf32> to vector<64x8xbf16>
    %c0_20 = arith.constant 0 : index
    %c8 = arith.constant 8 : index
    %27 = vector.load %arg8[%c0_20, %c8] : memref<64x72xbf16, #tpu.memory_space<vmem>>, vector<64x8xbf16>
    tpu.vector_store %arg8[%c0_20, %c8], %26 {strides = array<i32>} : memref<64x72xbf16, #tpu.memory_space<vmem>>, vector<64x8xbf16>,
    %c2 = arith.constant 2 : index
    %c0_21 = arith.constant 0 : index
    %28 = vector.load %arg7[%c2, %c0_21] : memref<82x8xf32, #tpu.memory_space<vmem>>, vector<64x8xf32>
    %29 = arith.mulf %28, %20 : vector<64x8xf32>
    %30 = arith.truncf %29 : vector<64x8xf32> to vector<64x8xbf16>
    %c0_22 = arith.constant 0 : index
    %c16 = arith.constant 16 : index
    %31 = vector.load %arg8[%c0_22, %c16] : memref<64x72xbf16, #tpu.memory_space<vmem>>, vector<64x8xbf16>
    tpu.vector_store %arg8[%c0_22, %c16], %30 {strides = array<i32>} : memref<64x72xbf16, #tpu.memory_space<vmem>>, vector<64x8xbf16>,
    %c8_23 = arith.constant 8 : index
    %c0_24 = arith.constant 0 : index
    %32 = vector.load %arg7[%c8_23, %c0_24] : memref<82x8xf32, #tpu.memory_space<vmem>>, vector<64x8xf32>
    %33 = arith.mulf %32, %17 : vector<64x8xf32>
    %34 = arith.truncf %33 : vector<64x8xf32> to vector<64x8xbf16>
    %c0_25 = arith.constant 0 : index
    %c24 = arith.constant 24 : index
    %35 = vector.load %arg8[%c0_25, %c24] : memref<64x72xbf16, #tpu.memory_space<vmem>>, vector<64x8xbf16>
    tpu.vector_store %arg8[%c0_25, %c24], %34 {strides = array<i32>} : memref<64x72xbf16, #tpu.memory_space<vmem>>, vector<64x8xbf16>,
    %c9_26 = arith.constant 9 : index
    %c0_27 = arith.constant 0 : index
    %36 = vector.load %arg7[%c9_26, %c0_27] : memref<82x8xf32, #tpu.memory_space<vmem>>, vector<64x8xf32>
    %37 = arith.truncf %36 : vector<64x8xf32> to vector<64x8xbf16>
    %c0_28 = arith.constant 0 : index
    %c32 = arith.constant 32 : index
    %38 = vector.load %arg8[%c0_28, %c32] : memref<64x72xbf16, #tpu.memory_space<vmem>>, vector<64x8xbf16>
    tpu.vector_store %arg8[%c0_28, %c32], %37 {strides = array<i32>} : memref<64x72xbf16, #tpu.memory_space<vmem>>, vector<64x8xbf16>,
    %c10 = arith.constant 10 : index
    %c0_29 = arith.constant 0 : index
    %39 = vector.load %arg7[%c10, %c0_29] : memref<82x8xf32, #tpu.memory_space<vmem>>, vector<64x8xf32>
    %40 = arith.mulf %39, %20 : vector<64x8xf32>
    %41 = arith.truncf %40 : vector<64x8xf32> to vector<64x8xbf16>
    %c0_30 = arith.constant 0 : index
    %c40 = arith.constant 40 : index
    %42 = vector.load %arg8[%c0_30, %c40] : memref<64x72xbf16, #tpu.memory_space<vmem>>, vector<64x8xbf16>
    tpu.vector_store %arg8[%c0_30, %c40], %41 {strides = array<i32>} : memref<64x72xbf16, #tpu.memory_space<vmem>>, vector<64x8xbf16>,
    %c16_31 = arith.constant 16 : index
    %c0_32 = arith.constant 0 : index
    %43 = vector.load %arg7[%c16_31, %c0_32] : memref<82x8xf32, #tpu.memory_space<vmem>>, vector<64x8xf32>
    %44 = arith.mulf %43, %17 : vector<64x8xf32>
    %45 = arith.truncf %44 : vector<64x8xf32> to vector<64x8xbf16>
    %c0_33 = arith.constant 0 : index
    %c48 = arith.constant 48 : index
    %46 = vector.load %arg8[%c0_33, %c48] : memref<64x72xbf16, #tpu.memory_space<vmem>>, vector<64x8xbf16>
    tpu.vector_store %arg8[%c0_33, %c48], %45 {strides = array<i32>} : memref<64x72xbf16, #tpu.memory_space<vmem>>, vector<64x8xbf16>,
    %c17 = arith.constant 17 : index
    %c0_34 = arith.constant 0 : index
    %47 = vector.load %arg7[%c17, %c0_34] : memref<82x8xf32, #tpu.memory_space<vmem>>, vector<64x8xf32>
    %48 = arith.truncf %47 : vector<64x8xf32> to vector<64x8xbf16>
    %c0_35 = arith.constant 0 : index
    %c56 = arith.constant 56 : index
    %49 = vector.load %arg8[%c0_35, %c56] : memref<64x72xbf16, #tpu.memory_space<vmem>>, vector<64x8xbf16>
    tpu.vector_store %arg8[%c0_35, %c56], %48 {strides = array<i32>} : memref<64x72xbf16, #tpu.memory_space<vmem>>, vector<64x8xbf16>,
    %c18 = arith.constant 18 : index
    %c0_36 = arith.constant 0 : index
    %50 = vector.load %arg7[%c18, %c0_36] : memref<82x8xf32, #tpu.memory_space<vmem>>, vector<64x8xf32>
    %51 = arith.mulf %50, %20 : vector<64x8xf32>
    %52 = arith.truncf %51 : vector<64x8xf32> to vector<64x8xbf16>
    %c0_37 = arith.constant 0 : index
    %c64 = arith.constant 64 : index
    %53 = vector.load %arg8[%c0_37, %c64] : memref<64x72xbf16, #tpu.memory_space<vmem>>, vector<64x8xbf16>
    tpu.vector_store %arg8[%c0_37, %c64], %52 {strides = array<i32>} : memref<64x72xbf16, #tpu.memory_space<vmem>>, vector<64x8xbf16>,
    %c0_38 = arith.constant 0 : index
    %c0_39 = arith.constant 0 : index
    %54 = vector.load %arg8[%c0_38, %c0_39] : memref<64x72xbf16, #tpu.memory_space<vmem>>, vector<64x72xbf16>
    %c0_40 = arith.constant 0 : index
    %c0_41 = arith.constant 0 : index
    %55 = vector.load %arg3[%c0_40, %c0_41] : memref<72x8xbf16, #tpu.memory_space<vmem>>, vector<72x8xbf16>
    %cst_42 = arith.constant dense<0.000000e+00> : vector<64x8xf32>
    %56 = tpu.matmul %54, %55, %cst_42 {dimension_numbers = #tpu.dot_dimension_numbers<[1], [0], [0], [1], [0, 0, 1, 1], [], []>} : vector<64x72xbf16>, vector<72x8xbf16>, vector<64x8xf32> -> vector<64x8xf32>
    %57 = arith.truncf %56 : vector<64x8xf32> to vector<64x8xbf16>
    %c0_43 = arith.constant 0 : index
    %c0_44 = arith.constant 0 : index
    %c0_45 = arith.constant 0 : index
    %58 = vector.load %arg5[%c0_43, %c0_44, %c0_45] : memref<1x64x8xbf16, #tpu.memory_space<vmem>>, vector<1x64x8xbf16>
    %59 = vector.shape_cast %58 : vector<1x64x8xbf16> to vector<64x8xbf16>
    %60 = vector.shape_cast %57 : vector<64x8xbf16> to vector<1x64x8xbf16>
    tpu.vector_store %arg5[%c0_43, %c0_44, %c0_45], %60 {strides = array<i32>} : memref<1x64x8xbf16, #tpu.memory_space<vmem>>, vector<1x64x8xbf16>,
    %cst_46 = arith.constant dense<0.000000e+00> : vector<8xf32>
    %61 = vector.multi_reduction <add>, %56, %cst_46 [0] : vector<64x8xf32> to vector<8xf32>
    %62 = vector.shape_cast %61 : vector<8xf32> to vector<1x8xf32>
    %c0_47 = arith.constant 0 : index
    %c0_48 = arith.constant 0 : index
    %c0_49 = arith.constant 0 : index
    %63 = vector.load %arg6[%c0_47, %c0_48, %c0_49] : memref<1x2x8xf32, #tpu.memory_space<vmem>>, vector<1x1x8xf32>
    %64 = vector.shape_cast %63 : vector<1x1x8xf32> to vector<1x8xf32>
    %65 = vector.shape_cast %62 : vector<1x8xf32> to vector<1x1x8xf32>
    tpu.vector_store %arg6[%c0_47, %c0_48, %c0_49], %65 {strides = array<i32>} : memref<1x2x8xf32, #tpu.memory_space<vmem>>, vector<1x1x8xf32>,
    %66 = arith.mulf %56, %56 : vector<64x8xf32>
    %cst_50 = arith.constant dense<0.000000e+00> : vector<8xf32>
    %67 = vector.multi_reduction <add>, %66, %cst_50 [0] : vector<64x8xf32> to vector<8xf32>
    %68 = vector.shape_cast %67 : vector<8xf32> to vector<1x8xf32>
    %c0_51 = arith.constant 0 : index
    %c1_52 = arith.constant 1 : index
    %c0_53 = arith.constant 0 : index
    %69 = vector.load %arg6[%c0_51, %c1_52, %c0_53] : memref<1x2x8xf32, #tpu.memory_space<vmem>>, vector<1x1x8xf32>
    %70 = vector.shape_cast %69 : vector<1x1x8xf32> to vector<1x8xf32>
    %71 = vector.shape_cast %68 : vector<1x8xf32> to vector<1x1x8xf32>
    tpu.vector_store %arg6[%c0_51, %c1_52, %c0_53], %71 {strides = array<i32>} : memref<1x2x8xf32, #tpu.memory_space<vmem>>, vector<1x1x8xf32>,
    return
  }
  func.func @transform_0(%arg0: i32) -> (i32, i32, i32) {
    %c0_i32 = arith.constant 0 : i32
    %c0_i32_0 = arith.constant 0 : i32
    %c0_i32_1 = arith.constant 0 : i32
    return %arg0, %c0_i32, %c0_i32_0 : i32, i32, i32
  }
  func.func @transform_1(%arg0: i32) -> (i32, i32) {
    %c0_i32 = arith.constant 0 : i32
    %c0_i32_0 = arith.constant 0 : i32
    %c0_i32_1 = arith.constant 0 : i32
    return %c0_i32, %c0_i32_0 : i32, i32
  }
  func.func @transform_2(%arg0: i32) -> (i32, i32) {
    %c0_i32 = arith.constant 0 : i32
    %c0_i32_0 = arith.constant 0 : i32
    %c0_i32_1 = arith.constant 0 : i32
    return %c0_i32, %c0_i32_0 : i32, i32
  }
  func.func @transform_3(%arg0: i32) -> (i32, i32) {
    %c0_i32 = arith.constant 0 : i32
    %c0_i32_0 = arith.constant 0 : i32
    %c0_i32_1 = arith.constant 0 : i32
    return %c0_i32, %c0_i32_0 : i32, i32
  }
  func.func @transform_4(%arg0: i32) -> (i32, i32, i32) {
    %c0_i32 = arith.constant 0 : i32
    %c0_i32_0 = arith.constant 0 : i32
    %c0_i32_1 = arith.constant 0 : i32
    return %arg0, %c0_i32, %c0_i32_0 : i32, i32, i32
  }
  func.func @transform_5(%arg0: i32) -> (i32, i32, i32) {
    %c0_i32 = arith.constant 0 : i32
    %c0_i32_0 = arith.constant 0 : i32
    %c0_i32_1 = arith.constant 0 : i32
    return %arg0, %c0_i32, %c0_i32_0 : i32, i32, i32
  }
}

module attributes {stable_mosaic.version = 11 : i64} {
  func.func @_conv_kernel(%arg0: i32, %arg1: memref<1x16x8x8xf32, #tpu.memory_space<vmem>>, %arg2: memref<36x8xbf16, #tpu.memory_space<vmem>>, %arg3: memref<64x2xf32, #tpu.memory_space<vmem>>, %arg4: memref<1x64x8xbf16, #tpu.memory_space<vmem>>, %arg5: memref<1x2x8xf32, #tpu.memory_space<vmem>>, %arg6: memref<82x4xf32, #tpu.memory_space<vmem>>, %arg7: memref<64x36xbf16, #tpu.memory_space<vmem>>) attributes {dimension_semantics = [#tpu.dimension_semantics<parallel>], iteration_bounds = array<i64: 2>, scalar_prefetch = 0 : i64, scratch_operands = 2 : i64, tpu.core_type = #tpu.core_type<tc>, window_params = [{transform_indices = @transform_0, window_bounds = array<i64: 1, 16, 8, 8>}, {pipeline_mode = #tpu.pipeline_mode<synchronous>, transform_indices = @transform_1, window_bounds = array<i64: 36, 8>}, {pipeline_mode = #tpu.pipeline_mode<synchronous>, transform_indices = @transform_2, window_bounds = array<i64: 64, 2>}, {transform_indices = @transform_3, window_bounds = array<i64: 1, 64, 8>}, {transform_indices = @transform_4, window_bounds = array<i64: 1, 2, 8>}]} {
    %c0 = arith.constant 0 : index
    %c0_0 = arith.constant 0 : index
    %c0_1 = arith.constant 0 : index
    %c0_2 = arith.constant 0 : index
    %0 = vector.load %arg1[%c0, %c0_0, %c0_1, %c0_2] : memref<1x16x8x8xf32, #tpu.memory_space<vmem>>, vector<1x16x8x4xf32>
    %1 = vector.shape_cast %0 : vector<1x16x8x4xf32> to vector<16x8x4xf32>
    %c0_3 = arith.constant 0 : index
    %c0_4 = arith.constant 0 : index
    %c0_5 = arith.constant 0 : index
    %c4 = arith.constant 4 : index
    %2 = vector.load %arg1[%c0_3, %c0_4, %c0_5, %c4] : memref<1x16x8x8xf32, #tpu.memory_space<vmem>>, vector<1x16x8x4xf32>
    %3 = vector.shape_cast %2 : vector<1x16x8x4xf32> to vector<16x8x4xf32>
    %4 = arith.maximumf %1, %3 : vector<16x8x4xf32>
    %5 = vector.shape_cast %4 : vector<16x8x4xf32> to vector<8x2x8x4xf32>
    %6 = vector.extract_strided_slice %5 {offsets = [0, 0, 0, 0], sizes = [8, 1, 8, 4], strides = [1, 1, 1, 1]} : vector<8x2x8x4xf32> to vector<8x1x8x4xf32>
    %7 = vector.shape_cast %6 : vector<8x1x8x4xf32> to vector<8x8x4xf32>
    %8 = vector.extract_strided_slice %5 {offsets = [0, 1, 0, 0], sizes = [8, 1, 8, 4], strides = [1, 1, 1, 1]} : vector<8x2x8x4xf32> to vector<8x1x8x4xf32>
    %9 = vector.shape_cast %8 : vector<8x1x8x4xf32> to vector<8x8x4xf32>
    %10 = arith.maximumf %7, %9 : vector<8x8x4xf32>
    %11 = vector.shape_cast %10 : vector<8x8x4xf32> to vector<64x4xf32>
    %cst = arith.constant 0.000000e+00 : f32
    %12 = vector.broadcast %cst : f32 to vector<9x4xf32>
    %c0_6 = arith.constant 0 : index
    %c0_7 = arith.constant 0 : index
    %13 = vector.load %arg6[%c0_6, %c0_7] : memref<82x4xf32, #tpu.memory_space<vmem>>, vector<9x4xf32>
    tpu.vector_store %arg6[%c0_6, %c0_7], %12 {strides = array<i32>} : memref<82x4xf32, #tpu.memory_space<vmem>>, vector<9x4xf32>,
    %c73 = arith.constant 73 : index
    %c0_8 = arith.constant 0 : index
    %14 = vector.load %arg6[%c73, %c0_8] : memref<82x4xf32, #tpu.memory_space<vmem>>, vector<9x4xf32>
    tpu.vector_store %arg6[%c73, %c0_8], %12 {strides = array<i32>} : memref<82x4xf32, #tpu.memory_space<vmem>>, vector<9x4xf32>,
    %c9 = arith.constant 9 : index
    %c0_9 = arith.constant 0 : index
    %15 = vector.load %arg6[%c9, %c0_9] : memref<82x4xf32, #tpu.memory_space<vmem>>, vector<64x4xf32>
    tpu.vector_store %arg6[%c9, %c0_9], %11 {strides = array<i32>} : memref<82x4xf32, #tpu.memory_space<vmem>>, vector<64x4xf32>,
    %c0_10 = arith.constant 0 : index
    %c0_11 = arith.constant 0 : index
    %16 = vector.load %arg3[%c0_10, %c0_11] : memref<64x2xf32, #tpu.memory_space<vmem>>, vector<64x1xf32>
    %17 = vector.shape_cast %16 : vector<64x1xf32> to vector<64x1xf32>
    %18 = vector.broadcast %17 : vector<64x1xf32> to vector<64x4xf32>
    %c0_12 = arith.constant 0 : index
    %c1 = arith.constant 1 : index
    %19 = vector.load %arg3[%c0_12, %c1] : memref<64x2xf32, #tpu.memory_space<vmem>>, vector<64x1xf32>
    %20 = vector.shape_cast %19 : vector<64x1xf32> to vector<64x1xf32>
    %21 = vector.broadcast %20 : vector<64x1xf32> to vector<64x4xf32>
    %c0_13 = arith.constant 0 : index
    %c0_14 = arith.constant 0 : index
    %22 = vector.load %arg6[%c0_13, %c0_14] : memref<82x4xf32, #tpu.memory_space<vmem>>, vector<64x4xf32>
    %23 = arith.mulf %22, %18 : vector<64x4xf32>
    %24 = arith.truncf %23 : vector<64x4xf32> to vector<64x4xbf16>
    %c0_15 = arith.constant 0 : index
    %c0_16 = arith.constant 0 : index
    %25 = vector.load %arg7[%c0_15, %c0_16] : memref<64x36xbf16, #tpu.memory_space<vmem>>, vector<64x4xbf16>
    tpu.vector_store %arg7[%c0_15, %c0_16], %24 {strides = array<i32>} : memref<64x36xbf16, #tpu.memory_space<vmem>>, vector<64x4xbf16>,
    %c1_17 = arith.constant 1 : index
    %c0_18 = arith.constant 0 : index
    %26 = vector.load %arg6[%c1_17, %c0_18] : memref<82x4xf32, #tpu.memory_space<vmem>>, vector<64x4xf32>
    %27 = arith.truncf %26 : vector<64x4xf32> to vector<64x4xbf16>
    %c0_19 = arith.constant 0 : index
    %c4_20 = arith.constant 4 : index
    %28 = vector.load %arg7[%c0_19, %c4_20] : memref<64x36xbf16, #tpu.memory_space<vmem>>, vector<64x4xbf16>
    tpu.vector_store %arg7[%c0_19, %c4_20], %27 {strides = array<i32>} : memref<64x36xbf16, #tpu.memory_space<vmem>>, vector<64x4xbf16>,
    %c2 = arith.constant 2 : index
    %c0_21 = arith.constant 0 : index
    %29 = vector.load %arg6[%c2, %c0_21] : memref<82x4xf32, #tpu.memory_space<vmem>>, vector<64x4xf32>
    %30 = arith.mulf %29, %21 : vector<64x4xf32>
    %31 = arith.truncf %30 : vector<64x4xf32> to vector<64x4xbf16>
    %c0_22 = arith.constant 0 : index
    %c8 = arith.constant 8 : index
    %32 = vector.load %arg7[%c0_22, %c8] : memref<64x36xbf16, #tpu.memory_space<vmem>>, vector<64x4xbf16>
    tpu.vector_store %arg7[%c0_22, %c8], %31 {strides = array<i32>} : memref<64x36xbf16, #tpu.memory_space<vmem>>, vector<64x4xbf16>,
    %c8_23 = arith.constant 8 : index
    %c0_24 = arith.constant 0 : index
    %33 = vector.load %arg6[%c8_23, %c0_24] : memref<82x4xf32, #tpu.memory_space<vmem>>, vector<64x4xf32>
    %34 = arith.mulf %33, %18 : vector<64x4xf32>
    %35 = arith.truncf %34 : vector<64x4xf32> to vector<64x4xbf16>
    %c0_25 = arith.constant 0 : index
    %c12 = arith.constant 12 : index
    %36 = vector.load %arg7[%c0_25, %c12] : memref<64x36xbf16, #tpu.memory_space<vmem>>, vector<64x4xbf16>
    tpu.vector_store %arg7[%c0_25, %c12], %35 {strides = array<i32>} : memref<64x36xbf16, #tpu.memory_space<vmem>>, vector<64x4xbf16>,
    %c9_26 = arith.constant 9 : index
    %c0_27 = arith.constant 0 : index
    %37 = vector.load %arg6[%c9_26, %c0_27] : memref<82x4xf32, #tpu.memory_space<vmem>>, vector<64x4xf32>
    %38 = arith.truncf %37 : vector<64x4xf32> to vector<64x4xbf16>
    %c0_28 = arith.constant 0 : index
    %c16 = arith.constant 16 : index
    %39 = vector.load %arg7[%c0_28, %c16] : memref<64x36xbf16, #tpu.memory_space<vmem>>, vector<64x4xbf16>
    tpu.vector_store %arg7[%c0_28, %c16], %38 {strides = array<i32>} : memref<64x36xbf16, #tpu.memory_space<vmem>>, vector<64x4xbf16>,
    %c10 = arith.constant 10 : index
    %c0_29 = arith.constant 0 : index
    %40 = vector.load %arg6[%c10, %c0_29] : memref<82x4xf32, #tpu.memory_space<vmem>>, vector<64x4xf32>
    %41 = arith.mulf %40, %21 : vector<64x4xf32>
    %42 = arith.truncf %41 : vector<64x4xf32> to vector<64x4xbf16>
    %c0_30 = arith.constant 0 : index
    %c20 = arith.constant 20 : index
    %43 = vector.load %arg7[%c0_30, %c20] : memref<64x36xbf16, #tpu.memory_space<vmem>>, vector<64x4xbf16>
    tpu.vector_store %arg7[%c0_30, %c20], %42 {strides = array<i32>} : memref<64x36xbf16, #tpu.memory_space<vmem>>, vector<64x4xbf16>,
    %c16_31 = arith.constant 16 : index
    %c0_32 = arith.constant 0 : index
    %44 = vector.load %arg6[%c16_31, %c0_32] : memref<82x4xf32, #tpu.memory_space<vmem>>, vector<64x4xf32>
    %45 = arith.mulf %44, %18 : vector<64x4xf32>
    %46 = arith.truncf %45 : vector<64x4xf32> to vector<64x4xbf16>
    %c0_33 = arith.constant 0 : index
    %c24 = arith.constant 24 : index
    %47 = vector.load %arg7[%c0_33, %c24] : memref<64x36xbf16, #tpu.memory_space<vmem>>, vector<64x4xbf16>
    tpu.vector_store %arg7[%c0_33, %c24], %46 {strides = array<i32>} : memref<64x36xbf16, #tpu.memory_space<vmem>>, vector<64x4xbf16>,
    %c17 = arith.constant 17 : index
    %c0_34 = arith.constant 0 : index
    %48 = vector.load %arg6[%c17, %c0_34] : memref<82x4xf32, #tpu.memory_space<vmem>>, vector<64x4xf32>
    %49 = arith.truncf %48 : vector<64x4xf32> to vector<64x4xbf16>
    %c0_35 = arith.constant 0 : index
    %c28 = arith.constant 28 : index
    %50 = vector.load %arg7[%c0_35, %c28] : memref<64x36xbf16, #tpu.memory_space<vmem>>, vector<64x4xbf16>
    tpu.vector_store %arg7[%c0_35, %c28], %49 {strides = array<i32>} : memref<64x36xbf16, #tpu.memory_space<vmem>>, vector<64x4xbf16>,
    %c18 = arith.constant 18 : index
    %c0_36 = arith.constant 0 : index
    %51 = vector.load %arg6[%c18, %c0_36] : memref<82x4xf32, #tpu.memory_space<vmem>>, vector<64x4xf32>
    %52 = arith.mulf %51, %21 : vector<64x4xf32>
    %53 = arith.truncf %52 : vector<64x4xf32> to vector<64x4xbf16>
    %c0_37 = arith.constant 0 : index
    %c32 = arith.constant 32 : index
    %54 = vector.load %arg7[%c0_37, %c32] : memref<64x36xbf16, #tpu.memory_space<vmem>>, vector<64x4xbf16>
    tpu.vector_store %arg7[%c0_37, %c32], %53 {strides = array<i32>} : memref<64x36xbf16, #tpu.memory_space<vmem>>, vector<64x4xbf16>,
    %c0_38 = arith.constant 0 : index
    %c0_39 = arith.constant 0 : index
    %55 = vector.load %arg7[%c0_38, %c0_39] : memref<64x36xbf16, #tpu.memory_space<vmem>>, vector<64x36xbf16>
    %c0_40 = arith.constant 0 : index
    %c0_41 = arith.constant 0 : index
    %56 = vector.load %arg2[%c0_40, %c0_41] : memref<36x8xbf16, #tpu.memory_space<vmem>>, vector<36x8xbf16>
    %cst_42 = arith.constant dense<0.000000e+00> : vector<64x8xf32>
    %57 = tpu.matmul %55, %56, %cst_42 {dimension_numbers = #tpu.dot_dimension_numbers<[1], [0], [0], [1], [0, 0, 1, 1], [], []>} : vector<64x36xbf16>, vector<36x8xbf16>, vector<64x8xf32> -> vector<64x8xf32>
    %58 = arith.truncf %57 : vector<64x8xf32> to vector<64x8xbf16>
    %c0_43 = arith.constant 0 : index
    %c0_44 = arith.constant 0 : index
    %c0_45 = arith.constant 0 : index
    %59 = vector.load %arg4[%c0_43, %c0_44, %c0_45] : memref<1x64x8xbf16, #tpu.memory_space<vmem>>, vector<1x64x8xbf16>
    %60 = vector.shape_cast %59 : vector<1x64x8xbf16> to vector<64x8xbf16>
    %61 = vector.shape_cast %58 : vector<64x8xbf16> to vector<1x64x8xbf16>
    tpu.vector_store %arg4[%c0_43, %c0_44, %c0_45], %61 {strides = array<i32>} : memref<1x64x8xbf16, #tpu.memory_space<vmem>>, vector<1x64x8xbf16>,
    %cst_46 = arith.constant dense<0.000000e+00> : vector<8xf32>
    %62 = vector.multi_reduction <add>, %57, %cst_46 [0] : vector<64x8xf32> to vector<8xf32>
    %63 = vector.shape_cast %62 : vector<8xf32> to vector<1x8xf32>
    %c0_47 = arith.constant 0 : index
    %c0_48 = arith.constant 0 : index
    %c0_49 = arith.constant 0 : index
    %64 = vector.load %arg5[%c0_47, %c0_48, %c0_49] : memref<1x2x8xf32, #tpu.memory_space<vmem>>, vector<1x1x8xf32>
    %65 = vector.shape_cast %64 : vector<1x1x8xf32> to vector<1x8xf32>
    %66 = vector.shape_cast %63 : vector<1x8xf32> to vector<1x1x8xf32>
    tpu.vector_store %arg5[%c0_47, %c0_48, %c0_49], %66 {strides = array<i32>} : memref<1x2x8xf32, #tpu.memory_space<vmem>>, vector<1x1x8xf32>,
    %67 = arith.mulf %57, %57 : vector<64x8xf32>
    %cst_50 = arith.constant dense<0.000000e+00> : vector<8xf32>
    %68 = vector.multi_reduction <add>, %67, %cst_50 [0] : vector<64x8xf32> to vector<8xf32>
    %69 = vector.shape_cast %68 : vector<8xf32> to vector<1x8xf32>
    %c0_51 = arith.constant 0 : index
    %c1_52 = arith.constant 1 : index
    %c0_53 = arith.constant 0 : index
    %70 = vector.load %arg5[%c0_51, %c1_52, %c0_53] : memref<1x2x8xf32, #tpu.memory_space<vmem>>, vector<1x1x8xf32>
    %71 = vector.shape_cast %70 : vector<1x1x8xf32> to vector<1x8xf32>
    %72 = vector.shape_cast %69 : vector<1x8xf32> to vector<1x1x8xf32>
    tpu.vector_store %arg5[%c0_51, %c1_52, %c0_53], %72 {strides = array<i32>} : memref<1x2x8xf32, #tpu.memory_space<vmem>>, vector<1x1x8xf32>,
    return
  }
  func.func @transform_0(%arg0: i32) -> (i32, i32, i32, i32) {
    %c0_i32 = arith.constant 0 : i32
    %c0_i32_0 = arith.constant 0 : i32
    %c0_i32_1 = arith.constant 0 : i32
    %c0_i32_2 = arith.constant 0 : i32
    return %arg0, %c0_i32, %c0_i32_0, %c0_i32_1 : i32, i32, i32, i32
  }
  func.func @transform_1(%arg0: i32) -> (i32, i32) {
    %c0_i32 = arith.constant 0 : i32
    %c0_i32_0 = arith.constant 0 : i32
    %c0_i32_1 = arith.constant 0 : i32
    return %c0_i32, %c0_i32_0 : i32, i32
  }
  func.func @transform_2(%arg0: i32) -> (i32, i32) {
    %c0_i32 = arith.constant 0 : i32
    %c0_i32_0 = arith.constant 0 : i32
    %c0_i32_1 = arith.constant 0 : i32
    return %c0_i32, %c0_i32_0 : i32, i32
  }
  func.func @transform_3(%arg0: i32) -> (i32, i32, i32) {
    %c0_i32 = arith.constant 0 : i32
    %c0_i32_0 = arith.constant 0 : i32
    %c0_i32_1 = arith.constant 0 : i32
    return %arg0, %c0_i32, %c0_i32_0 : i32, i32, i32
  }
  func.func @transform_4(%arg0: i32) -> (i32, i32, i32) {
    %c0_i32 = arith.constant 0 : i32
    %c0_i32_0 = arith.constant 0 : i32
    %c0_i32_1 = arith.constant 0 : i32
    return %arg0, %c0_i32, %c0_i32_0 : i32, i32, i32
  }
}

module attributes {stable_mosaic.version = 11 : i64} {
  func.func @_bn_relu_kernel(%arg0: i32, %arg1: memref<1x64x8xbf16, #tpu.memory_space<vmem>>, %arg2: memref<2x8xf32, #tpu.memory_space<vmem>>, %arg3: memref<1x64x8xf32, #tpu.memory_space<vmem>>) attributes {dimension_semantics = [#tpu.dimension_semantics<parallel>], iteration_bounds = array<i64: 2>, scalar_prefetch = 0 : i64, scratch_operands = 0 : i64, tpu.core_type = #tpu.core_type<tc>, window_params = [{transform_indices = @transform_0, window_bounds = array<i64: 1, 64, 8>}, {pipeline_mode = #tpu.pipeline_mode<synchronous>, transform_indices = @transform_1, window_bounds = array<i64: 2, 8>}, {transform_indices = @transform_2, window_bounds = array<i64: 1, 64, 8>}]} {
    %c0 = arith.constant 0 : index
    %c0_0 = arith.constant 0 : index
    %c0_1 = arith.constant 0 : index
    %0 = vector.load %arg1[%c0, %c0_0, %c0_1] : memref<1x64x8xbf16, #tpu.memory_space<vmem>>, vector<1x64x8xbf16>
    %1 = vector.shape_cast %0 : vector<1x64x8xbf16> to vector<64x8xbf16>
    %2 = arith.extf %1 : vector<64x8xbf16> to vector<64x8xf32>
    %c0_2 = arith.constant 0 : index
    %c0_3 = arith.constant 0 : index
    %3 = vector.load %arg2[%c0_2, %c0_3] : memref<2x8xf32, #tpu.memory_space<vmem>>, vector<1x8xf32>
    %4 = vector.broadcast %3 : vector<1x8xf32> to vector<64x8xf32>
    %5 = arith.mulf %2, %4 : vector<64x8xf32>
    %c1 = arith.constant 1 : index
    %c0_4 = arith.constant 0 : index
    %6 = vector.load %arg2[%c1, %c0_4] : memref<2x8xf32, #tpu.memory_space<vmem>>, vector<1x8xf32>
    %7 = vector.broadcast %6 : vector<1x8xf32> to vector<64x8xf32>
    %8 = arith.addf %5, %7 : vector<64x8xf32>
    %cst = arith.constant 0.000000e+00 : f32
    %9 = vector.broadcast %cst : f32 to vector<64x8xf32>
    %10 = arith.maximumf %8, %9 : vector<64x8xf32>
    %c0_5 = arith.constant 0 : index
    %c0_6 = arith.constant 0 : index
    %c0_7 = arith.constant 0 : index
    %11 = vector.load %arg3[%c0_5, %c0_6, %c0_7] : memref<1x64x8xf32, #tpu.memory_space<vmem>>, vector<1x64x8xf32>
    %12 = vector.shape_cast %11 : vector<1x64x8xf32> to vector<64x8xf32>
    %13 = vector.shape_cast %10 : vector<64x8xf32> to vector<1x64x8xf32>
    tpu.vector_store %arg3[%c0_5, %c0_6, %c0_7], %13 {strides = array<i32>} : memref<1x64x8xf32, #tpu.memory_space<vmem>>, vector<1x64x8xf32>,
    return
  }
  func.func @transform_0(%arg0: i32) -> (i32, i32, i32) {
    %c0_i32 = arith.constant 0 : i32
    %c0_i32_0 = arith.constant 0 : i32
    %c0_i32_1 = arith.constant 0 : i32
    return %arg0, %c0_i32, %c0_i32_0 : i32, i32, i32
  }
  func.func @transform_1(%arg0: i32) -> (i32, i32) {
    %c0_i32 = arith.constant 0 : i32
    %c0_i32_0 = arith.constant 0 : i32
    %c0_i32_1 = arith.constant 0 : i32
    return %c0_i32, %c0_i32_0 : i32, i32
  }
  func.func @transform_2(%arg0: i32) -> (i32, i32, i32) {
    %c0_i32 = arith.constant 0 : i32
    %c0_i32_0 = arith.constant 0 : i32
    %c0_i32_1 = arith.constant 0 : i32
    return %arg0, %c0_i32, %c0_i32_0 : i32, i32, i32
  }
}

</mosaic_0001>

<bundles_post_ra>
// kernel: down_forward.5
= control target key start
LH: loop header
LB: loop body
LE: loop exit
PB: predicated region body
PF: predicated region fallthrough
CT: control target
= control target key end

     0   :  { %s323_s9 = smov 0   ;;  %s358_s0 = inlined_call_operand.vmem [shape: bf16[2,64,8], index: 0, kind: input, shape index: {}]   ;;  %s359_s1 = inlined_call_operand.vmem [shape: f32[2,8], index: 1, kind: input, shape index: {}]   ;;  %s360_s2 = inlined_call_operand.vmem [shape: f32[2,64,8], index: 2, kind: output, shape index: {}]  }
   0x1 LB: > { %s258_s10 = sadd.s32 4294967295, %s306_s9   ;;  %p262_p0 = scmp.ge.s32.totalorder %s306_s9, 1  ;;  %s306_s9 = sphi %s323_s9, %s12_s9  }
   0x2   : > { %p112_p1 = scmp.lt.s32.totalorder %s306_s9, 3 }
   0x4   : > { %p113_p2 = pnand %p262_p0, %p112_p1 }
   0x5   : > { %p134_p3 = scmp.lt.s32.totalorder (!%p113_p2), %s258_s10, 1 }
   0x6   : > { %116 = sbr.rel (%p113_p2) target bundleno = 27 (0x1b), region = 28 }
   0xb   : > { %s362_s10 = smov (!%p134_p3, %s258_s10), 1  ;;  %v267_v0 = vld [vmem:[%s359_s1] ss:$0 sm:$0xff]  ;;  %vm194_vm0 = vcmask 64512   ;;  %v268_v9 = vld [vmem:[%s359_s1 + $0x1] ss:$0 sm:$0xff] }
   0xc   : > { %s271_s11 = sshll.u32 %s362_s10, 5  ;;  %s272_s19 = sshll.u32 %s362_s10, 6 }
   0xd   : > { %s138_s14 = scalar_lea.vmem %s358_s0, %s271_s11  ;;  %s143_s22 = scalar_lea.vmem %s360_s2, %s272_s19 }
   0xe   : > { %v274_v1 = vld [vmem:[%s138_s14] sm:$0xff]   ;;  %v289_v2 = vld [vmem:[%s138_s14 + $0x8] sm:$0xff]   ;;  %v290_v3 = vld [vmem:[%s138_s14 + $0x10] sm:$0xff]  }
   0xf   : > { %v275_v4 = vunpack.c.l.bf16 %v274_v1  ;;  %v276_v5 = vunpack.c.h.bf16 %v274_v1  ;;  %v279_v6 = vunpack.c.l.bf16 %v289_v2  ;;  %v280_v7 = vunpack.c.h.bf16 %v289_v2  ;;  %v291_v8 = vld [vmem:[%s138_s14 + $0x18] sm:$0xff]  }
  0x10   : > { %v283_v10 = vunpack.c.l.bf16 %v290_v3  ;;  %v284_v11 = vunpack.c.h.bf16 %v290_v3  ;;  %v287_v12 = vunpack.c.l.bf16 %v291_v8  ;;  %v288_v13 = vunpack.c.h.bf16 %v291_v8 }
  0x11   : > { %v165_v14 = vmul.f32 %v275_v4, %v267_v0  ;;  %v166_v15 = vmul.f32 %v276_v5, %v267_v0  ;;  %v167_v16 = vmul.f32 %v279_v6, %v267_v0  ;;  %v168_v17 = vmul.f32 %v280_v7, %v267_v0 }
  0x12   : > { %v169_v18 = vmul.f32 %v283_v10, %v267_v0  ;;  %v170_v19 = vmul.f32 %v284_v11, %v267_v0  ;;  %v171_v20 = vmul.f32 %v287_v12, %v267_v0  ;;  %v172_v21 = vmul.f32 %v288_v13, %v267_v0 }
  0x13   : > { %v178_v22 = vadd.f32 %v268_v9, %v165_v14  ;;  %v179_v23 = vadd.f32 %v268_v9, %v166_v15  ;;  %v180_v24 = vadd.f32 %v268_v9, %v167_v16  ;;  %v181_v25 = vadd.f32 %v268_v9, %v168_v17 }
  0x14   : > { %v182_v26 = vadd.f32 %v268_v9, %v169_v18  ;;  %v183_v27 = vadd.f32 %v268_v9, %v170_v19  ;;  %v184_v28 = vadd.f32 %v268_v9, %v171_v20  ;;  %v185_v29 = vadd.f32 %v268_v9, %v172_v21 }
  0x15   : > { %v186_v30 = vmax.f32 %v178_v22, 0.0  ;;  %v187_v31 = vmax.f32 %v179_v23, 0.0  ;;  %v188_v32 = vmax.f32 %v180_v24, 0.0  ;;  %v189_v33 = vmax.f32 %v181_v25, 0.0 }
  0x16   : > { %v190_v34 = vmax.f32 %v182_v26, 0.0  ;;  %v191_v35 = vmax.f32 %v183_v27, 0.0  ;;  %v192_v36 = vmax.f32 %v184_v28, 0.0  ;;  %v193_v37 = vmax.f32 %v185_v29, 0.0 }
  0x17   : > { %195 = vst.msk [vmem:[%s143_s22] sm:$0xff] %vm194_vm0, %v186_v30  ;;  %196 = vst.msk [vmem:[%s143_s22 + $0x8] sm:$0xff] %vm194_vm0, %v187_v31 }
  0x18   : > { %197 = vst.msk [vmem:[%s143_s22 + $0x10] sm:$0xff] %vm194_vm0, %v188_v32  ;;  %198 = vst.msk [vmem:[%s143_s22 + $0x18] sm:$0xff] %vm194_vm0, %v189_v33 }
  0x19   : > { %199 = vst.msk [vmem:[%s143_s22 + $0x20] sm:$0xff] %vm194_vm0, %v190_v34  ;;  %200 = vst.msk [vmem:[%s143_s22 + $0x28] sm:$0xff] %vm194_vm0, %v191_v35 }
  0x1a   : > { %201 = vst.msk [vmem:[%s143_s22 + $0x30] sm:$0xff] %vm194_vm0, %v192_v36  ;;  %202 = vst.msk [vmem:[%s143_s22 + $0x38] sm:$0xff] %vm194_vm0, %v193_v37 }
  0x1b PF: > { %s12_s9 = sadd.s32 1, %s306_s9  }
  0x1c   : > { %p9_p4 = scmp.ge.s32.totalorder %s12_s9, 4  }
  0x1e   :  { %11 = sbr.rel (!%p9_p4) target bundleno = 1 (0x1), region = 58 }

// kernel: down_forward.4
= control target key start
LH: loop header
LB: loop body
LE: loop exit
PB: predicated region body
PF: predicated region fallthrough
CT: control target
= control target key end

     0   :  { %s1656_s18 = smov 0   ;;  %s2104_s0 = inlined_call_operand.vmem [shape: bf16[2,64,8], index: 0, kind: input, shape index: {}]   ;;  %s2105_s1 = inlined_call_operand.vmem [shape: f32[2,8], index: 1, kind: input, shape index: {}]   ;;  %s2106_s2 = inlined_call_operand.vmem [shape: bf16[72,8], index: 2, kind: input, shape index: {}]   ;;  %s2107_s3 = inlined_call_operand.vmem [shape: f32[64,2], index: 3, kind: input, shape index: {}]   ;;  %s2108_s4 = inlined_call_operand.vmem [shape: bf16[2,64,8], index: 4, kind: output, shape index: {0}]   ;;  %s2109_s5 = inlined_call_operand.vmem [shape: f32[2,2,8], index: 5, kind: output, shape index: {1}]  }
   0x1 LB: > { %s1322_s19 = sadd.s32 4294967295, %s1613_s18   ;;  %p1326_p0 = scmp.ge.s32.totalorder %s1613_s18, 1  ;;  %s1613_s18 = sphi %s1656_s18, %s16_s18  }
   0x2   : > { %p190_p1 = scmp.lt.s32.totalorder %s1613_s18, 3 }
   0x4   : > { %p191_p2 = pnand %p1326_p0, %p190_p1 }
   0x5   : > { %p222_p3 = scmp.lt.s32.totalorder (!%p191_p2), %s1322_s19, 1  ;;  %s1618_s17 = smov (!%p191_p2), 8  }
   0x6   : > { %194 = sbr.rel (%p191_p2) target bundleno = 578 (0x242), region = 36  ;;  %s1619_s22 = smov (!%p191_p2), 32  }
   0x7   : > { %s1620_s23 = smov (!%p191_p2), 56   ;;  %s1621_s24 = smov (!%p191_p2), 16  }
   0x8   : > { %s1622_s25 = smov (!%p191_p2), 24   ;;  %s1623_s29 = smov (!%p191_p2), 40  }
   0x9   : > { %s1624_s9 = smov (!%p191_p2), 48   ;;  %s1625_s14 = smov (!%p191_p2), 64  }
   0xb   : > { %v301_v0 = vld [vmem:[%s2107_s3] sm:$0xff]  ;;  %vm287_vm0 = vcmask 64512   ;;  %v1615_v1 = vmov 1   ;;  %v1616_v2 = vmov 0   ;;  %vm289_vm1 = vcmask 57344   ;;  %v302_v4 = vld [vmem:[%s2107_s3 + $0x8] sm:$0xff] }
   0xc   : > { %1588 = vset.pattern.permute.xlu0 %v1615_v1  ;;  %1589 = vset.pattern.permute.xlu1 %v1616_v2  ;;  %v1617_v3 = vmov 0.0   ;;  %s2111_s19 = smov (!%p222_p3, %s1322_s19), 1  ;;  %v1681_v5 = vld [vmem:[%s2107_s3 + $0x10] sm:$0xff]  ;;  %v304_v6 = vld [vmem:[%s2107_s3 + $0x18] sm:$0xff]  ;;  %v1332_v7 = vld [vmem:[%s2105_s1] ss:$0 sm:$0xff] }
   0xd   : > { %311 = vperm.xlu1 %1589, %v301_v0   ;;  %350 = vperm.xlu0 %1588, %v301_v0   ;;  %288 = vst.msk [vmem:[#allocation2] sm:$0xff] %vm287_vm0, %v1617_v3  ;;  %291 = vst.msk [vmem:[#allocation2 + $0x49] sm:$0xff] %vm287_vm0, %v1617_v3  ;;  %s1429_s28 = sshll.u32 %s2111_s19, 5  ;;  %v1333_v16 = vld [vmem:[%s2105_s1 + $0x1] ss:$0 sm:$0xff]  ;;  %v306_v20 = vld [vmem:[%s2107_s3 + $0x28] sm:$0xff] }
   0xe   : > { %290 = vst.msk [vmem:[#allocation2 + $0x8] sm:$0x1] %vm289_vm1, %v1617_v3  ;;  %292 = vst.msk [vmem:[#allocation2 + $0x51] sm:$0x1] %vm289_vm1, %v1617_v3  ;;  %s226_s6 = scalar_lea.vmem %s2104_s0, %s1429_s28  ;;  %v307_v37 = vld [vmem:[%s2107_s3 + $0x30] sm:$0xff]  ;;  %v305_v46 = vld [vmem:[%s2107_s3 + $0x20] sm:$0xff] }
   0xf   : > { %v1512_v8 = vld [vmem:[%s226_s6] sm:$0xff]   ;;  %v1527_v9 = vld [vmem:[%s226_s6 + $0x8] sm:$0xff]   ;;  %v1528_v10 = vld [vmem:[%s226_s6 + $0x10] sm:$0xff]   ;;  %vm429_vm2 = vcmask 60416   ;;  %vm1075_vm3 = vcmask 1043456   ;;  %vm494_vm4 = vcmask 126016  }
  0x10   : > { %v1514_v11 = vunpack.c.h.bf16 %v1512_v8  ;;  %v1513_v12 = vunpack.c.l.bf16 %v1512_v8  ;;  %v1517_v13 = vunpack.c.l.bf16 %v1527_v9  ;;  %v1518_v14 = vunpack.c.h.bf16 %v1527_v9  ;;  %v1529_v15 = vld [vmem:[%s226_s6 + $0x18] sm:$0xff]  }
  0x11   : > { %316 = vperm.xlu1 %1589, %v302_v4   ;;  %354 = vperm.xlu0 %1588, %v302_v4   ;;  %v1522_v17 = vunpack.c.h.bf16 %v1528_v10  ;;  %v1521_v18 = vunpack.c.l.bf16 %v1528_v10  ;;  %v1525_v19 = vunpack.c.l.bf16 %v1529_v15  ;;  %v1526_v28 = vunpack.c.h.bf16 %v1529_v15  ;;  %v308_v52 = vld [vmem:[%s2107_s3 + $0x38] sm:$0xff] }
  0x12   : > { %v259_v21 = vmul.f32 %v1514_v11, %v1332_v7  ;;  %v258_v22 = vmul.f32 %v1513_v12, %v1332_v7  ;;  %v260_v23 = vmul.f32 %v1517_v13, %v1332_v7  ;;  %v261_v24 = vmul.f32 %v1518_v14, %v1332_v7 }
  0x13   : > { %v263_v25 = vmul.f32 %v1522_v17, %v1332_v7  ;;  %v262_v26 = vmul.f32 %v1521_v18, %v1332_v7  ;;  %v264_v27 = vmul.f32 %v1525_v19, %v1332_v7  ;;  %v265_v36 = vmul.f32 %v1526_v28, %v1332_v7 }
  0x14   : > { %v272_v29 = vadd.f32 %v1333_v16, %v259_v21  ;;  %v271_v30 = vadd.f32 %v1333_v16, %v258_v22  ;;  %v273_v31 = vadd.f32 %v1333_v16, %v260_v23  ;;  %v274_v32 = vadd.f32 %v1333_v16, %v261_v24 }
  0x15   : > { %1590 = vset.pattern.permute.xlu1 %v1615_v1  ;;  %358 = vperm.xlu0 %1588, %v1681_v5   ;;  %v276_v33 = vadd.f32 %v1333_v16, %v263_v25  ;;  %v275_v34 = vadd.f32 %v1333_v16, %v262_v26  ;;  %v277_v35 = vadd.f32 %v1333_v16, %v264_v27  ;;  %v438_v55 = vld [vmem:[#allocation2 + $0x1] sm:$0xff]  ;;  %vm567_vm5 = vcmask 191616  }
  0x16   : > { %362 = vperm.xlu1 %1590, %v304_v6   ;;  %v280_v38 = vmax.f32 %v272_v29, 0.0  ;;  %v279_v39 = vmax.f32 %v271_v30, 0.0  ;;  %v281_v40 = vmax.f32 %v273_v31, 0.0  ;;  %v282_v41 = vmax.f32 %v274_v32, 0.0 }
  0x17   : > { %v284_v42 = vmax.f32 %v276_v33, 0.0  ;;  %v283_v43 = vmax.f32 %v275_v34, 0.0  ;;  %v285_v44 = vmax.f32 %v277_v35, 0.0  ;;  %v278_v45 = vadd.f32 %v1333_v16, %v265_v36 }
  0x18   : > { %294 = vst.msk [vmem:[#allocation2 + $0x11] sm:$0xff] %vm287_vm0, %v280_v38  ;;  %293 = vst.msk [vmem:[#allocation2 + $0x9] sm:$0xff] %vm287_vm0, %v279_v39  ;;  %v1439_v58 = vpack.c.bf16 %v438_v55, %v438_v55  ;;  %vm640_vm6 = vcmask 257216   ;;  %vm705_vm7 = vcmask 322816   ;;  %vm778_vm8 = vcmask 388416  }
  0x19   : > { %370 = vperm.xlu0 %1588, %v306_v20   ;;  %295 = vst.msk [vmem:[#allocation2 + $0x19] sm:$0xff] %vm287_vm0, %v281_v40  ;;  %296 = vst.msk [vmem:[#allocation2 + $0x21] sm:$0xff] %vm287_vm0, %v282_v41  ;;  %v286_v47 = vmax.f32 %v278_v45, 0.0  ;;  %vm851_vm9 = vcmask 454016   ;;  %vm916_vm10 = vcmask 519616   ;;  %vm989_vm11 = vcmask 585216  }
  0x1a   : > { %1591 = vset.pattern.permute.xlu1 %v1616_v2  ;;  %298 = vst.msk [vmem:[#allocation2 + $0x31] sm:$0xff] %vm287_vm0, %v284_v42  ;;  %297 = vst.msk [vmem:[#allocation2 + $0x29] sm:$0xff] %vm287_vm0, %v283_v43  ;;  %vm1062_vm12 = vcmask 588800  }
  0x1b   : > { %326 = vperm.xlu1 %1591, %v304_v6   ;;  %299 = vst.msk [vmem:[#allocation2 + $0x39] sm:$0xff] %vm287_vm0, %v285_v44  ;;  %300 = vst.msk [vmem:[#allocation2 + $0x41] sm:$0xff] %vm287_vm0, %v286_v47 }
  0x1d   : > { %374 = vperm.xlu0 %1588, %v307_v37  }
  0x1f   : > { %1592 = vset.pattern.permute.xlu1 %v1615_v1  ;;  %v649_v48 = vld [vmem:[#allocation2 + $0x9] sm:$0xff]  ;;  %v440_v53 = vld [vmem:[#allocation2 + $0x11] sm:$0xff] }
  0x20   : > { %366 = vperm.xlu1 %1592, %v305_v46   ;;  %v1463_v49 = vpack.c.bf16 %v649_v48, %v649_v48  ;;  %v651_v50 = vld [vmem:[#allocation2 + $0x19] sm:$0xff]  ;;  %v862_v54 = vld [vmem:[#allocation2 + $0x21] sm:$0xff]  ;;  %v1441_v56 = vpack.c.bf16 %v440_v53, %v440_v53  ;;  %v714_v10 = vld [vmem:[#allocation2 + $0xa] sm:$0xff] }
  0x21   : > { %1594 = vset.pattern.permute.xlu0 %v1616_v2  ;;  %v1465_v51 = vpack.c.bf16 %v651_v50, %v651_v50  ;;  %v1489_v57 = vpack.c.bf16 %v862_v54, %v862_v54  ;;  %v863_v59 = vld [vmem:[#allocation2 + $0x29] sm:$0xff]  ;;  %v444_v63 = vld [vmem:[#allocation2 + $0x31] sm:$0xff]  ;;  %v1773_v19 = vld [vmem:[#allocation2 + $0x1a] sm:$0xff] }
  0x22   : > { %321 = vperm.xlu0 %1594, %v1681_v5   ;;  %v1490_v60 = vpack.c.bf16 %v863_v59, %v863_v59  ;;  %v655_v61 = vld [vmem:[#allocation2 + $0x39] sm:$0xff]  ;;  %v1744_v0 = vpack.c.bf16 %v444_v63, %v444_v63  ;;  %v576_v9 = vld [vmem:[#allocation2 + $0x8] sm:$0xff]  ;;  %v1784_v24 = vld [vmem:[#allocation2 + $0x10] sm:$0xff] }
  0x23   : > { %v1738_v62 = vpack.c.bf16 %v655_v61, %v655_v61  ;;  %v1769_v17 = vld [vmem:[#allocation2 + $0x12] sm:$0xff]  ;;  %v1790_v29 = vld [vmem:[#allocation2 + $0x20] sm:$0xff]  ;;  %v1834_v61 = vld [vmem:[#allocation2 + $0x28] sm:$0xff] }
  0x24   : > { %1593 = vset.pattern.permute.xlu1 %v1616_v2  ;;  %v788_v30 = vld [vmem:[#allocation2 + $0x18] sm:$0xff]  ;;  %v1804_v41 = vld [vmem:[#allocation2 + $0x22] sm:$0xff]  ;;  %v1598_v54 = vld [vmem:[%s2106_s2 + $0x20] ss:$0 sps:$4 sm:$0xff]  }
  0x25   : > { %331 = vperm.xlu1 %1593, %v305_v46   ;;  %v1813_v46 = vld [vmem:[#allocation2 + $0x30] sm:$0xff]  ;;  %1567 = vmatprep.subr.msk.bf16.mxu0 %vm1075_vm3, %v1598_v54  ;;  %v1077_v59 = vsel %vm1075_vm3, %v1598_v54, 0 }
  0x26   : > { %341 = vperm.xlu0 %1594, %v307_v37   ;;  %1568 = vmatprep.subr.msk.bf16.mxu1 %vm1075_vm3, %v1598_v54 }
  0x27   : > { %1540 = vmatpush3.bf16.msra.mxu0 %v1077_v59  ;;  %1562 = vmatpush3.bf16.msra.mxu1 %v1077_v59 }
  0x29   : > { %336 = vperm.xlu1 %1593, %v306_v20  }
  0x2a   : > { %472 = vrot.lane.b32.xlu0 %v1463_v49, %s1618_s17 }
  0x2b   : > { %1597 = vset.pattern.permute.xlu0 %v1615_v1 }
  0x2d   : > { %1595 = vset.pattern.permute.xlu1 %v1615_v1  ;;  %v381_v1 = vld [vmem:[#allocation2] sm:$0xff] }
  0x2e   : > { %378 = vperm.xlu1 %1595, %v308_v52   ;;  %476 = vrot.lane.b32.xlu0 %v1465_v51, %s1618_s17 }
  0x32   : > { %1596 = vset.pattern.permute.xlu1 %v1616_v2  ;;  %683 = vrot.lane.b32.xlu0 %v1441_v56, %s1619_s22  ;;  %v503_v2 = vld [vmem:[#allocation2 + $0x2] sm:$0xff] }
  0x33   : > { %346 = vperm.xlu1 %1596, %v308_v52  }
  0x36   : > { %687 = vrot.lane.b32.xlu0 %v1489_v57, %s1619_s22 }
  0x37   : > { %470 = vrot.lane.b32.xlu1 %v1439_v58, %s1618_s17 }
  0x3a   : > { %894 = vrot.lane.b32.xlu0 %v1465_v51, %s1620_s23 }
  0x3b   : > { %474 = vrot.lane.b32.xlu1 %v1441_v56, %s1618_s17 }
  0x3e   : > { %898 = vrot.lane.b32.xlu0 %v1490_v60, %s1620_s23 }
  0x3f   : > { %681 = vrot.lane.b32.xlu1 %v1463_v49, %s1619_s22 }
  0x42   : > { %480 = vrot.lane.b32.xlu0 %v1490_v60, %s1618_s17 }
  0x43   : > { %685 = vrot.lane.b32.xlu1 %v1465_v51, %s1619_s22 }
  0x46   : > { %484 = vrot.lane.b32.xlu0 %v1738_v62, %s1618_s17 }
  0x47   : > { %892 = vrot.lane.b32.xlu1 %v1441_v56, %s1620_s23 }
  0x4a   : > { %691 = vrot.lane.b32.xlu0 %v1744_v0, %s1619_s22 }
  0x4b   : > { %896 = vrot.lane.b32.xlu1 %v1489_v57, %s1620_s23 }
  0x4f   : > { %478 = vrot.lane.b32.xlu1 %v1489_v57, %s1618_s17 }
  0x53   : > { %482 = vrot.lane.b32.xlu1 %v1744_v0, %s1618_s17  ;;  %s2061_s17 = scalar_lea.vmem %s2108_s4, %s1429_s28  ;;  %s1331_s28 = sshll.u32 %s2111_s19, 1 }
  0x57   : > { %689 = vrot.lane.b32.xlu1 %v1490_v60, %s1619_s22 }
  0x5b   : > { %693 = vrot.lane.b32.xlu1 %v1738_v62, %s1619_s22 }
  0x88   : > { %v1755_v3 = vpop.permute.xlu1 %311  ;;  %v1757_v4 = vpop.permute.xlu0 %350 }
  0x89   : > { %v389_v5 = vmul.f32 %v381_v1, %v1755_v3  ;;  %v511_v6 = vmul.f32 %v503_v2, %v1757_v4  ;;  %v584_v23 = vmul.f32 %v576_v9, %v1755_v3  ;;  %v722_v45 = vmul.f32 %v714_v10, %v1757_v4 }
  0x8b   : > { %v1431_v7 = vpack.c.bf16 %v389_v5, %v389_v5  ;;  %v1447_v8 = vpack.c.bf16 %v511_v6, %v511_v6  ;;  %v1455_v34 = vpack.c.bf16 %v584_v23, %v584_v23  ;;  %v1471_v57 = vpack.c.bf16 %v722_v45, %v722_v45 }
  0x8c   : > { %v1761_v11 = vpop.permute.xlu1 %316  ;;  %v1763_v12 = vpop.permute.xlu0 %354 }
  0x8d   : > { %v390_v13 = vmul.f32 %v576_v9, %v1761_v11  ;;  %v512_v14 = vmul.f32 %v714_v10, %v1763_v12  ;;  %543 = vrot.lane.b32.xlu1 %v1447_v8, %s1621_s24  ;;  %430 = vst.msk [vmem:[#allocation3] sm:$0xf] %vm429_vm2, %v1431_v7  ;;  %v585_v26 = vmul.f32 %v1784_v24, %v1761_v11  ;;  %v1599_v7 = vld [vmem:[%s2106_s2 + $0x18] sm:$0xff]  }
  0x8e   : > { %v723_v40 = vmul.f32 %v1769_v17, %v1763_v12  ;;  %v796_v56 = vmul.f32 %v788_v30, %v1761_v11  ;;  %v795_v8 = vmul.f32 %v1784_v24, %v1755_v3  ;;  %1541 = vmatprep.subr.bf16.mxu0 %v1599_v7  ;;  %1558 = vmatprep.subr.bf16.mxu1 %v1599_v7 }
  0x8f   : > { %v1432_v15 = vpack.c.bf16 %v390_v13, %v390_v13  ;;  %v1448_v16 = vpack.c.bf16 %v512_v14, %v512_v14  ;;  %v1456_v36 = vpack.c.bf16 %v585_v26, %v585_v26  ;;  %1542 = vmatpush3.bf16.msra.mxu0 %v1599_v7  ;;  %1563 = vmatpush3.bf16.msra.mxu1 %v1599_v7  ;;  %v1601_v26 = vld [vmem:[%s2106_s2 + $0x8] sm:$0xff]  }
  0x90   : > { %v1771_v18 = vpop.permute.xlu0 %358  ;;  %v1472_v50 = vpack.c.bf16 %v723_v40, %v723_v40  ;;  %v1480_v13 = vpack.c.bf16 %v796_v56, %v796_v56  ;;  %v1896_v40 = vld [vmem:[#allocation2 + $0x3a] sm:$0xff] }
  0x91   : > { %v513_v20 = vmul.f32 %v1769_v17, %v1771_v18  ;;  %v1777_v21 = vpop.permute.xlu1 %362  ;;  %545 = vrot.lane.b32.xlu0 %v1448_v16, %s1621_s24  ;;  %431 = vst.msk [vmem:[#allocation3 + $0x4] sm:$0xf] %vm429_vm2, %v1432_v15  ;;  %v724_v60 = vmul.f32 %v1773_v19, %v1771_v18  ;;  %v1600_v15 = vld [vmem:[%s2106_s2 + $0x10] sm:$0xff]   ;;  %v1479_v16 = vpack.c.bf16 %v795_v8, %v795_v8  ;;  %v793_v56 = vld [vmem:[#allocation2 + $0x40] sm:$0xff] }
  0x92   : > { %v514_v22 = vmul.f32 %v1773_v19, %v1777_v21  ;;  %v725_v47 = vmul.f32 %v1804_v41, %v1777_v21  ;;  %1543 = vmatprep.subr.bf16.mxu0 %v1600_v15  ;;  %1559 = vmatprep.subr.bf16.mxu1 %v1600_v15  ;;  %v656_v8 = vld [vmem:[#allocation2 + $0x41] sm:$0xff] }
  0x93   : > { %v1449_v25 = vpack.c.bf16 %v513_v20, %v513_v20  ;;  %v1473_v11 = vpack.c.bf16 %v724_v60, %v724_v60  ;;  %v934_v20 = vmul.f32 %v1773_v19, %v1763_v12  ;;  %1544 = vmatpush3.bf16.msra.mxu0 %v1600_v15  ;;  %1564 = vmatpush3.bf16.msra.mxu1 %v1600_v15 }
  0x94   : > { %v1788_v27 = vpop.permute.xlu0 %370  ;;  %v1450_v28 = vpack.c.bf16 %v514_v22, %v514_v22  ;;  %v1474_v1 = vpack.c.bf16 %v725_v47, %v725_v47  ;;  %v933_v19 = vmul.f32 %v1769_v17, %v1757_v4  ;;  %1545 = vmatprep.subr.bf16.mxu0 %v1601_v26  ;;  %1560 = vmatprep.subr.bf16.mxu1 %v1601_v26 }
  0x95   : > { %547 = vrot.lane.b32.xlu1 %v1449_v25, %s1621_s24 }
  0x96   : > { %549 = vrot.lane.b32.xlu0 %v1450_v28, %s1621_s24  ;;  %v327_v31 = vpop.permute.xlu1 %326  ;;  %v1871_v28 = vld [vmem:[#allocation2 + $0x38] sm:$0xff]  ;;  %v1495_v17 = vpack.c.bf16 %v933_v19, %v933_v19 }
  0x97   : > { %v392_v32 = vmul.f32 %v788_v30, %v327_v31  ;;  %v587_v33 = vmul.f32 %v1790_v29, %v327_v31  ;;  %v798_v10 = vmul.f32 %v1834_v61, %v327_v31  ;;  %1546 = vmatpush3.bf16.msra.mxu0 %v1601_v26  ;;  %1565 = vmatpush3.bf16.msra.mxu1 %v1601_v26 }
  0x98   : > { %v1795_v35 = vpop.permute.xlu0 %374 }
  0x99   : > { %v1434_v37 = vpack.c.bf16 %v392_v32, %v392_v32  ;;  %616 = vrot.lane.b32.xlu1 %v1455_v34, %s1622_s25  ;;  %v1458_v38 = vpack.c.bf16 %v587_v33, %v587_v33  ;;  %v1482_v23 = vpack.c.bf16 %v798_v10, %v798_v10  ;;  %v1496_v32 = vpack.c.bf16 %v934_v20, %v934_v20  ;;  %v931_v20 = vld [vmem:[#allocation2 + $0x42] sm:$0xff] }
  0x9a   : > { %618 = vrot.lane.b32.xlu0 %v1456_v36, %s1622_s25  ;;  %v1602_v36 = vld [vmem:[%s2106_s2] sm:$0xff]  }
  0x9b   : > { %v1799_v39 = vpop.permute.xlu1 %366  ;;  %433 = vst.msk [vmem:[#allocation3 + $0xc] sm:$0xf] %vm429_vm2, %v1434_v37  ;;  %1547 = vmatprep.subr.bf16.mxu0 %v1602_v36  ;;  %1561 = vmatprep.subr.bf16.mxu1 %v1602_v36 }
  0x9c   : > { %1548 = vmatpush3.bf16.msra.mxu0 %v1602_v36  ;;  %1566 = vmatpush3.bf16.msra.mxu1 %v1602_v36 }
  0x9d   : > { %v1806_v42 = vpop.permute.xlu0 %321 }
  0x9e   : > { %v391_v43 = vmul.f32 %v1784_v24, %v1806_v42  ;;  %v586_v44 = vmul.f32 %v788_v30, %v1806_v42  ;;  %622 = vrot.lane.b32.xlu0 %v1458_v38, %s1622_s25  ;;  %v797_v22 = vmul.f32 %v1790_v29, %v1806_v42  ;;  %v1864_v24 = vld [vmem:[#allocation2 + $0x2a] sm:$0xff] }
  0x9f   : > { %v936_v30 = vmul.f32 %v1864_v24, %v1777_v21  ;;  %v935_v21 = vmul.f32 %v1804_v41, %v1771_v18  ;;  %v516_v37 = vmul.f32 %v1864_v24, %v1788_v27  ;;  %v515_v18 = vmul.f32 %v1804_v41, %v1799_v39 }
  0xa0   : > { %v1433_v48 = vpack.c.bf16 %v391_v43, %v391_v43  ;;  %v1457_v49 = vpack.c.bf16 %v586_v44, %v586_v44  ;;  %v1817_v51 = vpop.permute.xlu1 %331  ;;  %v1481_v31 = vpack.c.bf16 %v797_v22, %v797_v22  ;;  %v728_v22 = vmul.f32 %v1896_v40, %v1795_v35 }
  0xa1   : > { %v1819_v52 = vpop.permute.xlu0 %341  ;;  %v393_v53 = vmul.f32 %v1790_v29, %v1817_v51  ;;  %v1498_v38 = vpack.c.bf16 %v936_v30, %v936_v30  ;;  %v1497_v45 = vpack.c.bf16 %v935_v21, %v935_v21  ;;  %v1452_v47 = vpack.c.bf16 %v516_v37, %v516_v37  ;;  %v932_v37 = vld [vmem:[#allocation2 + $0x4a] sm:$0xff] }
  0xa2   : > { %v395_v55 = vmul.f32 %v1813_v46, %v1819_v52  ;;  %620 = vrot.lane.b32.xlu1 %v1457_v49, %s1622_s25  ;;  %756 = vrot.lane.b32.xlu0 %v1472_v50, %s1623_s29  ;;  %432 = vst.msk [vmem:[#allocation3 + $0x8] sm:$0xf] %vm429_vm2, %v1433_v48  ;;  %v1451_v41 = vpack.c.bf16 %v515_v18, %v515_v18 }
  0xa3   : > { %v1435_v58 = vpack.c.bf16 %v393_v53, %v393_v53  ;;  %v1913_v53 = vld [vmem:[#allocation2 + $0x32] sm:$0xff]  ;;  %v588_v60 = vmul.f32 %v1834_v61, %v1817_v51  ;;  %v801_v36 = vmul.f32 %v793_v56, %v1819_v52 }
  0xa4   : > { %v1437_v63 = vpack.c.bf16 %v395_v55, %v395_v55  ;;  %v1836_v2 = vpop.permute.xlu1 %336  ;;  %v517_v54 = vmul.f32 %v1913_v53, %v1795_v35 }
  0xa5   : > { %v394_v5 = vmul.f32 %v1834_v61, %v1836_v2  ;;  %434 = vst.msk [vmem:[#allocation3 + $0x10] sm:$0xf] %vm429_vm2, %v1435_v58  ;;  %v473_v6 = vpop.permute.xlu0 %472  ;;  %v589_v55 = vmul.f32 %v1813_v46, %v1836_v2  ;;  %v1459_v10 = vpack.c.bf16 %v588_v60, %v588_v60  ;;  %v1470_v61 = vpack.c.bf16 %v656_v8, %v656_v8 }
  0xa6   : > { %754 = vrot.lane.b32.xlu1 %v1471_v57, %s1623_s29  ;;  %760 = vrot.lane.b32.xlu0 %v1474_v1, %s1623_s29  ;;  %436 = vst.msk [vmem:[#allocation3 + $0x18] sm:$0xf] %vm429_vm2, %v1437_v63  ;;  %v1453_v63 = vpack.c.bf16 %v517_v54, %v517_v54  ;;  %v800_v30 = vmul.f32 %v1871_v28, %v1836_v2  ;;  %v867_v2 = vld [vmem:[#allocation2 + $0x49] sm:$0xff] }
  0xa7   : > { %496 = vst.msk [vmem:[#allocation3 + $0x4] sm:$0xf] %vm494_vm4, %v473_v6  ;;  %v1436_v9 = vpack.c.bf16 %v394_v5, %v394_v5  ;;  %v1460_v1 = vpack.c.bf16 %v589_v55, %v589_v55 }
  0xa8   : > { %v1484_v21 = vpack.c.bf16 %v800_v30, %v800_v30 }
  0xa9   : > { %435 = vst.msk [vmem:[#allocation3 + $0x14] sm:$0xf] %vm429_vm2, %v1436_v9  ;;  %v477_v14 = vpop.permute.xlu0 %476  ;;  %v1857_v3 = vpop.permute.xlu1 %378  ;;  %v590_v9 = vmul.f32 %v1871_v28, %v1819_v52  ;;  %v1494_v52 = vpack.c.bf16 %v867_v2, %v867_v2 }
  0xaa   : > { %758 = vrot.lane.b32.xlu1 %v1473_v11, %s1623_s29  ;;  %829 = vrot.lane.b32.xlu0 %v1480_v13, %s1624_s9  ;;  %498 = vst.msk [vmem:[#allocation3 + $0xc] sm:$0xf] %vm494_vm4, %v477_v14  ;;  %v518_v43 = vmul.f32 %v1896_v40, %v1857_v3  ;;  %v727_v13 = vmul.f32 %v1913_v53, %v1788_v27 }
  0xab   : > { %v726_v14 = vmul.f32 %v1864_v24, %v1799_v39  ;;  %v1461_v15 = vpack.c.bf16 %v590_v9, %v590_v9 }
  0xac   : > { %v1454_v49 = vpack.c.bf16 %v518_v43, %v518_v43  ;;  %v1476_v19 = vpack.c.bf16 %v727_v13, %v727_v13  ;;  %v940_v43 = vmul.f32 %v932_v37, %v1857_v3 }
  0xad   : > { %v1866_v25 = vpop.permute.xlu0 %683  ;;  %v1475_v26 = vpack.c.bf16 %v726_v14, %v726_v14 }
  0xae   : > { %827 = vrot.lane.b32.xlu1 %v1479_v16, %s1624_s9  ;;  %833 = vrot.lane.b32.xlu0 %v1482_v23, %s1624_s9  ;;  %v1875_v12 = vpop.permute.xlu1 %346  ;;  %v729_v23 = vmul.f32 %v931_v20, %v1857_v3 }
  0xaf   : > { %v396_v29 = vmul.f32 %v1871_v28, %v1875_v12  ;;  %v591_v58 = vmul.f32 %v793_v56, %v1875_v12  ;;  %v938_v28 = vmul.f32 %v1896_v40, %v1788_v27  ;;  %v1502_v27 = vpack.c.bf16 %v940_v43, %v940_v43 }
  0xb1   : > { %v1438_v33 = vpack.c.bf16 %v396_v29, %v396_v29  ;;  %v1883_v34 = vpop.permute.xlu0 %687  ;;  %v1462_v6 = vpack.c.bf16 %v591_v58, %v591_v58  ;;  %v799_v29 = vmul.f32 %v1813_v46, %v1817_v51  ;;  %v1485_v46 = vpack.c.bf16 %v801_v36, %v801_v36 }
  0xb2   : > { %831 = vrot.lane.b32.xlu1 %v1481_v31, %s1624_s9  ;;  %967 = vrot.lane.b32.xlu0 %v1496_v32, %s1625_s14  ;;  %v471_v4 = vpop.permute.xlu1 %470  ;;  %v1477_v31 = vpack.c.bf16 %v728_v22, %v728_v22  ;;  %v1478_v32 = vpack.c.bf16 %v729_v23, %v729_v23 }
  0xb3   : > { %495 = vst.msk [vmem:[#allocation3] sm:$0xf] %vm494_vm4, %v471_v4 }
  0xb4   : > { %437 = vst.msk [vmem:[#allocation3 + $0x1c] sm:$0xf] %vm429_vm2, %v1438_v33  ;;  %v794_v33 = vld [vmem:[#allocation2 + $0x48] sm:$0xff] }
  0xb5   : > { %v1898_v42 = vpop.permute.xlu0 %894  ;;  %v802_v4 = vmul.f32 %v794_v33, %v1875_v12  ;;  %v937_v12 = vmul.f32 %v1913_v53, %v1799_v39 }
  0xb6   : > { %965 = vrot.lane.b32.xlu1 %v1495_v17, %s1625_s14  ;;  %971 = vrot.lane.b32.xlu0 %v1498_v38, %s1625_s14  ;;  %v475_v44 = vpop.permute.xlu1 %474  ;;  %v1483_v17 = vpack.c.bf16 %v799_v29, %v799_v29  ;;  %v939_v38 = vmul.f32 %v931_v20, %v1795_v35 }
  0xb7   : > { %497 = vst.msk [vmem:[#allocation3 + $0x8] sm:$0xf] %vm494_vm4, %v475_v44  ;;  %v1486_v51 = vpack.c.bf16 %v802_v4, %v802_v4  ;;  %v1500_v44 = vpack.c.bf16 %v938_v28, %v938_v28 }
  0xb9   : > { %v1907_v48 = vpop.permute.xlu0 %898 }
  0xba   : > { %969 = vrot.lane.b32.xlu1 %v1497_v45, %s1625_s14  ;;  %553 = vrot.lane.b32.xlu0 %v1452_v47, %s1621_s24  ;;  %v1911_v50 = vpop.permute.xlu1 %681 }
  0xbd   : > { %v481_v57 = vpop.permute.xlu0 %480 }
  0xbe   : > { %551 = vrot.lane.b32.xlu1 %v1451_v41, %s1621_s24  ;;  %557 = vrot.lane.b32.xlu0 %v1454_v49, %s1621_s24  ;;  %v1922_v59 = vpop.permute.xlu1 %685  ;;  %500 = vst.msk [vmem:[#allocation3 + $0x14] sm:$0xf] %vm494_vm4, %v481_v57 }
  0xc1   : > { %v485_v5 = vpop.permute.xlu0 %484 }
  0xc2   : > { %555 = vrot.lane.b32.xlu1 %v1453_v63, %s1621_s24  ;;  %626 = vrot.lane.b32.xlu0 %v1460_v1, %s1622_s25  ;;  %v1929_v7 = vpop.permute.xlu1 %892  ;;  %502 = vst.msk [vmem:[#allocation3 + $0x1c] sm:$0xf] %vm494_vm4, %v485_v5 }
  0xc5   : > { %v1983_v35 = vpop.permute.xlu0 %691 }
  0xc6   : > { %624 = vrot.lane.b32.xlu1 %v1459_v10, %s1622_s25  ;;  %630 = vrot.lane.b32.xlu0 %v1462_v6, %s1622_s25  ;;  %v1936_v11 = vpop.permute.xlu1 %896 }
  0xca   : > { %628 = vrot.lane.b32.xlu1 %v1461_v15, %s1622_s25  ;;  %695 = vrot.lane.b32.xlu0 %v1470_v61, %s1619_s22  ;;  %v479_v16 = vpop.permute.xlu1 %478  ;;  %s235_s22 = scalar_lea.vmem %s2109_s5, %s1331_s28 }
  0xcb   : > { %499 = vst.msk [vmem:[#allocation3 + $0x10] sm:$0xf] %vm494_vm4, %v479_v16 }
  0xce   : > { %762 = vrot.lane.b32.xlu1 %v1475_v26, %s1623_s29  ;;  %764 = vrot.lane.b32.xlu0 %v1476_v19, %s1623_s29  ;;  %v483_v24 = vpop.permute.xlu1 %482 }
  0xcf   : > { %501 = vst.msk [vmem:[#allocation3 + $0x18] sm:$0xf] %vm494_vm4, %v483_v24 }
  0xd2   : > { %766 = vrot.lane.b32.xlu1 %v1477_v31, %s1623_s29  ;;  %768 = vrot.lane.b32.xlu0 %v1478_v32, %s1623_s29  ;;  %v1979_v39 = vpop.permute.xlu1 %689 }
  0xd6   : > { %835 = vrot.lane.b32.xlu1 %v1483_v17, %s1624_s9  ;;  %837 = vrot.lane.b32.xlu0 %v1484_v21, %s1624_s9  ;;  %v1981_v40 = vpop.permute.xlu1 %693 }
  0xda   : > { %839 = vrot.lane.b32.xlu1 %v1485_v46, %s1624_s9  ;;  %841 = vrot.lane.b32.xlu0 %v1486_v51, %s1624_s9 }
  0xde   : > { %900 = vrot.lane.b32.xlu1 %v1744_v0, %s1620_s23  ;;  %902 = vrot.lane.b32.xlu0 %v1738_v62, %s1620_s23  ;;  %v1499_v0 = vpack.c.bf16 %v937_v12, %v937_v12  ;;  %v1501_v62 = vpack.c.bf16 %v939_v38, %v939_v38 }
  0xe2   : > { %904 = vrot.lane.b32.xlu1 %v1470_v61, %s1620_s23  ;;  %906 = vrot.lane.b32.xlu0 %v1494_v52, %s1620_s23 }
  0xe6   : > { %973 = vrot.lane.b32.xlu1 %v1499_v0, %s1625_s14  ;;  %975 = vrot.lane.b32.xlu0 %v1500_v44, %s1625_s14 }
  0xea   : > { %977 = vrot.lane.b32.xlu1 %v1501_v62, %s1625_s14  ;;  %979 = vrot.lane.b32.xlu0 %v1502_v27, %s1625_s14 }
  0xff   : > { %v544_v3 = vpop.permute.xlu1 %543 }
 0x100   : > { %568 = vst.msk [vmem:[#allocation3] sm:$0xf] %vm567_vm5, %v544_v3 }
 0x103   : > { %v546_v18 = vpop.permute.xlu0 %545 }
 0x104   : > { %569 = vst.msk [vmem:[#allocation3 + $0x4] sm:$0xf] %vm567_vm5, %v546_v18 }
 0x107   : > { %v548_v45 = vpop.permute.xlu1 %547 }
 0x108   : > { %570 = vst.msk [vmem:[#allocation3 + $0x8] sm:$0xf] %vm567_vm5, %v548_v45  ;;  %v550_v47 = vpop.permute.xlu0 %549 }
 0x109   : > { %571 = vst.msk [vmem:[#allocation3 + $0xc] sm:$0xf] %vm567_vm5, %v550_v47 }
 0x10b   : > { %v617_v49 = vpop.permute.xlu1 %616 }
 0x10c   : > { %641 = vst.msk [vmem:[#allocation3] sm:$0xf] %vm640_vm6, %v617_v49  ;;  %v619_v53 = vpop.permute.xlu0 %618 }
 0x10d   : > { %642 = vst.msk [vmem:[#allocation3 + $0x4] sm:$0xf] %vm640_vm6, %v619_v53 }
 0x10e   : > { %706 = vst.msk [vmem:[#allocation3] sm:$0xf] %vm705_vm7, %v1911_v50  ;;  %707 = vst.msk [vmem:[#allocation3 + $0x4] sm:$0xf] %vm705_vm7, %v1866_v25 }
 0x110   : > { %v623_v54 = vpop.permute.xlu0 %622 }
 0x111   : > { %644 = vst.msk [vmem:[#allocation3 + $0xc] sm:$0xf] %vm640_vm6, %v623_v54 }
 0x112   : > { %709 = vst.msk [vmem:[#allocation3 + $0xc] sm:$0xf] %vm705_vm7, %v1883_v34 }
 0x114   : > { %v621_v55 = vpop.permute.xlu1 %620  ;;  %v757_v41 = vpop.permute.xlu0 %756 }
 0x115   : > { %643 = vst.msk [vmem:[#allocation3 + $0x8] sm:$0xf] %vm640_vm6, %v621_v55 }
 0x116   : > { %780 = vst.msk [vmem:[#allocation3 + $0x4] sm:$0xf] %vm778_vm8, %v757_v41 }
 0x117   : > { %708 = vst.msk [vmem:[#allocation3 + $0x8] sm:$0xf] %vm705_vm7, %v1922_v59 }
 0x118   : > { %v755_v50 = vpop.permute.xlu1 %754  ;;  %v761_v56 = vpop.permute.xlu0 %760 }
 0x119   : > { %779 = vst.msk [vmem:[#allocation3] sm:$0xf] %vm778_vm8, %v755_v50  ;;  %782 = vst.msk [vmem:[#allocation3 + $0xc] sm:$0xf] %vm778_vm8, %v761_v56 }
 0x11c   : > { %v759_v25 = vpop.permute.xlu1 %758  ;;  %v830_v57 = vpop.permute.xlu0 %829 }
 0x11d   : > { %781 = vst.msk [vmem:[#allocation3 + $0x8] sm:$0xf] %vm778_vm8, %v759_v25 }
 0x11e   : > { %853 = vst.msk [vmem:[#allocation3 + $0x4] sm:$0xf] %vm851_vm9, %v830_v57 }
 0x11f   : > { %918 = vst.msk [vmem:[#allocation3 + $0x4] sm:$0xf] %vm916_vm10, %v1898_v42 }
 0x120   : > { %v828_v34 = vpop.permute.xlu1 %827  ;;  %v834_v58 = vpop.permute.xlu0 %833 }
 0x121   : > { %852 = vst.msk [vmem:[#allocation3] sm:$0xf] %vm851_vm9, %v828_v34  ;;  %855 = vst.msk [vmem:[#allocation3 + $0xc] sm:$0xf] %vm851_vm9, %v834_v58 }
 0x122   : > { %917 = vst.msk [vmem:[#allocation3] sm:$0xf] %vm916_vm10, %v1929_v7  ;;  %920 = vst.msk [vmem:[#allocation3 + $0xc] sm:$0xf] %vm916_vm10, %v1907_v48 }
 0x124   : > { %v832_v59 = vpop.permute.xlu1 %831  ;;  %v968_v60 = vpop.permute.xlu0 %967 }
 0x125   : > { %854 = vst.msk [vmem:[#allocation3 + $0x8] sm:$0xf] %vm851_vm9, %v832_v59 }
 0x126   : > { %991 = vst.msk [vmem:[#allocation3 + $0x4] sm:$0xf] %vm989_vm11, %v968_v60 }
 0x127   : > { %919 = vst.msk [vmem:[#allocation3 + $0x8] sm:$0xf] %vm916_vm10, %v1936_v11 }
 0x128   : > { %v966_v42 = vpop.permute.xlu1 %965  ;;  %v972_v63 = vpop.permute.xlu0 %971 }
 0x129   : > { %990 = vst.msk [vmem:[#allocation3] sm:$0xf] %vm989_vm11, %v966_v42  ;;  %993 = vst.msk [vmem:[#allocation3 + $0xc] sm:$0xf] %vm989_vm11, %v972_v63 }
 0x12c   : > { %v970_v1 = vpop.permute.xlu1 %969  ;;  %v554_v5 = vpop.permute.xlu0 %553 }
 0x12d   : > { %992 = vst.msk [vmem:[#allocation3 + $0x8] sm:$0xf] %vm989_vm11, %v970_v1 }
 0x12e   : > { %573 = vst.msk [vmem:[#allocation3 + $0x14] sm:$0xf] %vm567_vm5, %v554_v5 }
 0x130   : > { %v552_v48 = vpop.permute.xlu1 %551  ;;  %v558_v6 = vpop.permute.xlu0 %557  ;;  %v1603_v7 = vld [vmem:[#allocation3] sm:$0xff]  }
 0x131   : > { %572 = vst.msk [vmem:[#allocation3 + $0x10] sm:$0xf] %vm567_vm5, %v552_v48  ;;  %575 = vst.msk [vmem:[#allocation3 + $0x1c] sm:$0xf] %vm567_vm5, %v558_v6  ;;  %1549 = vmatprep.mubr.msk.bf16.mxu0 %vm1062_vm12, %v1603_v7 }
 0x134   : > { %v556_v8 = vpop.permute.xlu1 %555  ;;  %v627_v9 = vpop.permute.xlu0 %626  ;;  %v1604_v10 = vld [vmem:[#allocation3 + $0x8] sm:$0xff]  }
 0x135   : > { %574 = vst.msk [vmem:[#allocation3 + $0x18] sm:$0xf] %vm567_vm5, %v556_v8  ;;  %1550 = vmatmul.mubr.msk.bf16.vlgmr.msra.gmra.mxu0 %vm1062_vm12, %v1604_v10 }
 0x136   : > { %646 = vst.msk [vmem:[#allocation3 + $0x14] sm:$0xf] %vm640_vm6, %v627_v9 }
 0x137   : > { %711 = vst.msk [vmem:[#allocation3 + $0x14] sm:$0xf] %vm705_vm7, %v1983_v35 }
 0x138   : > { %v625_v61 = vpop.permute.xlu1 %624  ;;  %v631_v11 = vpop.permute.xlu0 %630 }
 0x139   : > { %645 = vst.msk [vmem:[#allocation3 + $0x10] sm:$0xf] %vm640_vm6, %v625_v61  ;;  %648 = vst.msk [vmem:[#allocation3 + $0x1c] sm:$0xf] %vm640_vm6, %v631_v11 }
 0x13a   : > { %710 = vst.msk [vmem:[#allocation3 + $0x10] sm:$0xf] %vm705_vm7, %v1979_v39 }
 0x13c   : > { %v629_v13 = vpop.permute.xlu1 %628  ;;  %v696_v14 = vpop.permute.xlu0 %695 }
 0x13d   : > { %647 = vst.msk [vmem:[#allocation3 + $0x18] sm:$0xf] %vm640_vm6, %v629_v13 }
 0x13e   : > { %713 = vst.msk [vmem:[#allocation3 + $0x1c] sm:$0xf] %vm705_vm7, %v696_v14  ;;  %712 = vst.msk [vmem:[#allocation3 + $0x18] sm:$0xf] %vm705_vm7, %v1981_v40 }
 0x140   : > { %v763_v15 = vpop.permute.xlu1 %762  ;;  %v765_v16 = vpop.permute.xlu0 %764 }
 0x141   : > { %783 = vst.msk [vmem:[#allocation3 + $0x10] sm:$0xf] %vm778_vm8, %v763_v15  ;;  %784 = vst.msk [vmem:[#allocation3 + $0x14] sm:$0xf] %vm778_vm8, %v765_v16 }
 0x144   : > { %v767_v20 = vpop.permute.xlu1 %766  ;;  %v769_v22 = vpop.permute.xlu0 %768 }
 0x145   : > { %785 = vst.msk [vmem:[#allocation3 + $0x18] sm:$0xf] %vm778_vm8, %v767_v20  ;;  %786 = vst.msk [vmem:[#allocation3 + $0x1c] sm:$0xf] %vm778_vm8, %v769_v22 }
 0x148   : > { %v836_v23 = vpop.permute.xlu1 %835  ;;  %v838_v26 = vpop.permute.xlu0 %837 }
 0x149   : > { %856 = vst.msk [vmem:[#allocation3 + $0x10] sm:$0xf] %vm851_vm9, %v836_v23  ;;  %857 = vst.msk [vmem:[#allocation3 + $0x14] sm:$0xf] %vm851_vm9, %v838_v26 }
 0x14c   : > { %v840_v19 = vpop.permute.xlu1 %839  ;;  %v842_v24 = vpop.permute.xlu0 %841 }
 0x14d   : > { %858 = vst.msk [vmem:[#allocation3 + $0x18] sm:$0xf] %vm851_vm9, %v840_v19  ;;  %859 = vst.msk [vmem:[#allocation3 + $0x1c] sm:$0xf] %vm851_vm9, %v842_v24 }
 0x150   : > { %v901_v29 = vpop.permute.xlu1 %900  ;;  %v903_v30 = vpop.permute.xlu0 %902 }
 0x151   : > { %921 = vst.msk [vmem:[#allocation3 + $0x10] sm:$0xf] %vm916_vm10, %v901_v29  ;;  %922 = vst.msk [vmem:[#allocation3 + $0x14] sm:$0xf] %vm916_vm10, %v903_v30 }
 0x154   : > { %v905_v31 = vpop.permute.xlu1 %904  ;;  %v907_v32 = vpop.permute.xlu0 %906 }
 0x155   : > { %923 = vst.msk [vmem:[#allocation3 + $0x18] sm:$0xf] %vm916_vm10, %v905_v31  ;;  %924 = vst.msk [vmem:[#allocation3 + $0x1c] sm:$0xf] %vm916_vm10, %v907_v32 }
 0x158   : > { %v974_v33 = vpop.permute.xlu1 %973  ;;  %v976_v36 = vpop.permute.xlu0 %975 }
 0x159   : > { %994 = vst.msk [vmem:[#allocation3 + $0x10] sm:$0xf] %vm989_vm11, %v974_v33  ;;  %995 = vst.msk [vmem:[#allocation3 + $0x14] sm:$0xf] %vm989_vm11, %v976_v36 }
 0x15c   : > { %v978_v4 = vpop.permute.xlu1 %977  ;;  %v980_v17 = vpop.permute.xlu0 %979 }
 0x15d   : > { %996 = vst.msk [vmem:[#allocation3 + $0x18] sm:$0xf] %vm989_vm11, %v978_v4  ;;  %997 = vst.msk [vmem:[#allocation3 + $0x1c] sm:$0xf] %vm989_vm11, %v980_v17 }
 0x160   : > { %v1605_v21 = vld [vmem:[#allocation3 + $0x10] sm:$0xff]  }
 0x161   : > { %1553 = vmatprep.mubr.msk.bf16.mxu1 %vm1062_vm12, %v1605_v21 }
 0x164   : > { %v1606_v46 = vld [vmem:[#allocation3 + $0x18] sm:$0xff]  }
 0x165   : > { %1554 = vmatmul.mubr.msk.bf16.vlgmr.msra.gmra.mxu1 %vm1062_vm12, %v1606_v46 }
 0x1f5   : > { %v1551_v51 = vpop.f32.mrf.mxu0 }
 0x1f6   : > { %v1505_v2 = vpack.c.bf16 %v1551_v51, %v1551_v51  ;;  %v1208_v35 = vmul.f32 %v1551_v51, %v1551_v51  ;;  %v1187_v45 = vsel %vm287_vm0, %v1551_v51, 0.0 }
 0x1f7   : > { %v1113_v52 = vpop.f32.mrf.mxu0 }
 0x1f8   : > { %1178 = vst.msk [vmem:[%s2061_s17 + $0x8] sm:$0xf] %vm429_vm2, %v1505_v2  ;;  %v1503_v28 = vpack.c.bf16 %v1113_v52, %v1113_v52  ;;  %v1206_v44 = vmul.f32 %v1113_v52, %v1113_v52  ;;  %v1184_v27 = vsel %vm287_vm0, %v1113_v52, 0.0  ;;  %v1217_v53 = vsel %vm287_vm0, %v1208_v35, 0.0 }
 0x1f9   : > { %v1552_v12 = vpop.f32.mrf.mxu0 }
 0x1fa   : > { %1176 = vst.msk [vmem:[%s2061_s17] sm:$0xf] %vm429_vm2, %v1503_v28  ;;  %v1506_v37 = vpack.c.bf16 %v1552_v12, %v1552_v12  ;;  %v1214_v3 = vsel %vm287_vm0, %v1206_v44, 0.0  ;;  %v1209_v54 = vmul.f32 %v1552_v12, %v1552_v12  ;;  %v1189_v56 = vsel %vm287_vm0, %v1552_v12, 0.0 }
 0x1fb   : > { %v1116_v38 = vpop.f32.mrf.mxu0 }
 0x1fc   : > { %1179 = vst.msk [vmem:[%s2061_s17 + $0xc] sm:$0xf] %vm429_vm2, %v1506_v37  ;;  %v1504_v43 = vpack.c.bf16 %v1116_v38, %v1116_v38  ;;  %v1207_v0 = vmul.f32 %v1116_v38, %v1116_v38  ;;  %v1185_v62 = vsel %vm287_vm0, %v1116_v38, 0.0  ;;  %v1219_v60 = vsel %vm287_vm0, %v1209_v54, 0.0 }
 0x1fd   : > { %v1186_v40 = vadd.f32 %v1185_v62, %v1184_v27 }
 0x1fe   : > { %1177 = vst.msk [vmem:[%s2061_s17 + $0x4] sm:$0xf] %vm429_vm2, %v1504_v43  ;;  %v1215_v39 = vsel %vm287_vm0, %v1207_v0, 0.0 }
 0x1ff   : > { %v1216_v18 = vadd.f32 %v1215_v39, %v1214_v3  ;;  %v1188_v47 = vadd.f32 %v1187_v45, %v1186_v40 }
 0x201   : > { %v1218_v41 = vadd.f32 %v1217_v53, %v1216_v18  ;;  %v1190_v58 = vadd.f32 %v1189_v56, %v1188_v47 }
 0x203   : > { %v1220_v5 = vadd.f32 %v1219_v60, %v1218_v41 }
 0x225   : > { %v1555_v49 = vpop.f32.mrf.mxu1 }
 0x226   : > { %v1509_v55 = vpack.c.bf16 %v1555_v49, %v1555_v49  ;;  %v1212_v6 = vmul.f32 %v1555_v49, %v1555_v49  ;;  %v1195_v11 = vsel %vm287_vm0, %v1555_v49, 0.0 }
 0x227   : > { %v1129_v50 = vpop.f32.mrf.mxu1 }
 0x228   : > { %1182 = vst.msk [vmem:[%s2061_s17 + $0x18] sm:$0xf] %vm429_vm2, %v1509_v55  ;;  %v1507_v25 = vpack.c.bf16 %v1129_v50, %v1129_v50  ;;  %v1191_v57 = vsel %vm287_vm0, %v1129_v50, 0.0  ;;  %v1210_v34 = vmul.f32 %v1129_v50, %v1129_v50  ;;  %v1225_v20 = vsel %vm287_vm0, %v1212_v6, 0.0 }
 0x229   : > { %v1556_v59 = vpop.f32.mrf.mxu1  ;;  %v1192_v1 = vadd.f32 %v1191_v57, %v1190_v58 }
 0x22a   : > { %1180 = vst.msk [vmem:[%s2061_s17 + $0x10] sm:$0xf] %vm429_vm2, %v1507_v25  ;;  %v1221_v42 = vsel %vm287_vm0, %v1210_v34, 0.0  ;;  %v1510_v63 = vpack.c.bf16 %v1556_v59, %v1556_v59  ;;  %v1213_v13 = vmul.f32 %v1556_v59, %v1556_v59  ;;  %v1197_v22 = vsel %vm287_vm0, %v1556_v59, 0.0 }
 0x22b   : > { %v1132_v48 = vpop.f32.mrf.mxu1  ;;  %v1222_v10 = vadd.f32 %v1221_v42, %v1220_v5 }
 0x22c   : > { %1183 = vst.msk [vmem:[%s2061_s17 + $0x1c] sm:$0xf] %vm429_vm2, %v1510_v63  ;;  %v1508_v7 = vpack.c.bf16 %v1132_v48, %v1132_v48  ;;  %v1193_v8 = vsel %vm287_vm0, %v1132_v48, 0.0  ;;  %v1211_v9 = vmul.f32 %v1132_v48, %v1132_v48  ;;  %v1227_v19 = vsel %vm287_vm0, %v1213_v13, 0.0 }
 0x22d   : > { %v1194_v61 = vadd.f32 %v1193_v8, %v1192_v1 }
 0x22e   : > { %1181 = vst.msk [vmem:[%s2061_s17 + $0x14] sm:$0xf] %vm429_vm2, %v1508_v7  ;;  %v1223_v14 = vsel %vm287_vm0, %v1211_v9, 0.0 }
 0x22f   : > { %v1196_v15 = vadd.f32 %v1195_v11, %v1194_v61  ;;  %v1224_v16 = vadd.f32 %v1223_v14, %v1222_v10 }
 0x231   : > { %v1198_v23 = vadd.f32 %v1197_v22, %v1196_v15  ;;  %v1226_v26 = vadd.f32 %v1225_v20, %v1224_v16 }
 0x233   : > { %v1199_v24 = vrot.slane %v1198_v23, 4  ;;  %v1228_v29 = vadd.f32 %v1227_v19, %v1226_v26 }
 0x235   : > { %v1200_v30 = vadd.f32 %v1199_v24, %v1198_v23  ;;  %v1229_v31 = vrot.slane %v1228_v29, 4 }
 0x237   : > { %v1201_v32 = vrot.slane %v1200_v30, 2  ;;  %v1230_v33 = vadd.f32 %v1229_v31, %v1228_v29 }
 0x239   : > { %v1202_v36 = vadd.f32 %v1201_v32, %v1200_v30  ;;  %v1231_v4 = vrot.slane %v1230_v33, 2 }
 0x23b   : > { %v1203_v17 = vrot.slane %v1202_v36, 1  ;;  %v1232_v21 = vadd.f32 %v1231_v4, %v1230_v33 }
 0x23d   : > { %v1204_v46 = vadd.f32 %v1203_v17, %v1202_v36  ;;  %v1233_v51 = vrot.slane %v1232_v21, 1 }
 0x23f   : > { %1205 = vst.msk [vmem:[%s235_s22] sm:$0x1] %vm289_vm1, %v1204_v46  ;;  %v1234_v2 = vadd.f32 %v1233_v51, %v1232_v21 }
 0x241   : > { %1235 = vst.msk [vmem:[%s235_s22 + $0x1] sm:$0x1] %vm289_vm1, %v1234_v2 }
 0x242 PF: > { %s16_s18 = sadd.s32 1, %s1613_s18  }
 0x243   : > { %p13_p4 = scmp.ge.s32.totalorder %s16_s18, 4  }
 0x245   :  { %15 = sbr.rel (!%p13_p4) target bundleno = 1 (0x1), region = 78 }

// kernel: down_forward.3
= control target key start
LH: loop header
LB: loop body
LE: loop exit
PB: predicated region body
PF: predicated region fallthrough
CT: control target
= control target key end

     0   :  { %s1633_s15 = smov 0   ;;  %s2099_s0 = inlined_call_operand.vmem [shape: f32[2,16,8,8], index: 0, kind: input, shape index: {}]   ;;  %s2100_s1 = inlined_call_operand.vmem [shape: bf16[36,8], index: 1, kind: input, shape index: {}]   ;;  %s2101_s2 = inlined_call_operand.vmem [shape: f32[64,2], index: 2, kind: input, shape index: {}]   ;;  %s2102_s3 = inlined_call_operand.vmem [shape: bf16[2,64,8], index: 3, kind: output, shape index: {0}]   ;;  %s2103_s4 = inlined_call_operand.vmem [shape: f32[2,2,8], index: 4, kind: output, shape index: {1}]  }
   0x1 LB: > { %s1336_s16 = sadd.s32 4294967295, %s1594_s15   ;;  %p1340_p0 = scmp.ge.s32.totalorder %s1594_s15, 1  ;;  %s1594_s15 = sphi %s1633_s15, %s15_s15  }
   0x2   : > { %p165_p1 = scmp.lt.s32.totalorder %s1594_s15, 3 }
   0x4   : > { %p166_p2 = pnand %p1340_p0, %p165_p1 }
   0x5   : > { %p195_p3 = scmp.lt.s32.totalorder (!%p166_p2), %s1336_s16, 1  ;;  %s1598_s21 = smov (!%p166_p2), 124  }
   0x6   : > { %169 = sbr.rel (%p166_p2) target bundleno = 621 (0x26d), region = 32  ;;  %s1600_s10 = smov (!%p166_p2), 4  }
   0x7   : > { %s1601_s13 = smov (!%p166_p2), 16   ;;  %s1602_s14 = smov (!%p166_p2), 28  }
   0x8   : > { %s1604_s18 = smov (!%p166_p2), 12   ;;  %s1605_s19 = smov (!%p166_p2), 20  }
   0x9   : > { %s1607_s25 = smov (!%p166_p2), 32  }
   0xb   : > { %v1596_v0 = vmov 1   ;;  %vm314_vm0 = vcmask 31744   ;;  %vm316_vm1 = vcmask 24576   ;;  %s2105_s16 = smov (!%p195_p3, %s1336_s16), 1  ;;  %v1597_v1 = vmov 0.0   ;;  %v329_v14 = vld [vmem:[%s2101_s2 + $0x8] sm:$0xff] }
   0xc   : > { %1571 = vset.pattern.permute.xlu1 %v1596_v0  ;;  %1570 = vset.pattern.permute.xlu0 %v1596_v0  ;;  %315 = vst.msk [vmem:[#allocation2] sm:$0xff] %vm314_vm0, %v1597_v1  ;;  %318 = vst.msk [vmem:[#allocation2 + $0x49] sm:$0xff] %vm314_vm0, %v1597_v1  ;;  %s1439_s17 = sshll.u32 %s2105_s16, 7  ;;  %v328_v15 = vld [vmem:[%s2101_s2] sm:$0xff]  ;;  %v1599_v17 = vmov 0   ;;  %v330_v19 = vld [vmem:[%s2101_s2 + $0x10] sm:$0xff] }
   0xd   : > { %317 = vst.msk [vmem:[#allocation2 + $0x8] sm:$0x1] %vm316_vm1, %v1597_v1  ;;  %319 = vst.msk [vmem:[#allocation2 + $0x51] sm:$0x1] %vm316_vm1, %v1597_v1  ;;  %s1651_s20 = scalar_lea.vmem %s2099_s0, %s1439_s17  ;;  %v332_v20 = vld [vmem:[%s2101_s2 + $0x20] sm:$0xff]  ;;  %v331_v21 = vld [vmem:[%s2101_s2 + $0x18] sm:$0xff] }
   0xe   : > { %v1654_v2 = vld [vmem:[%s1651_s20 + $0x10] sm:$0xff]  ;;  %v1657_v3 = vld [vmem:[%s1651_s20] sm:$0xff]  ;;  %v1664_v4 = vld [vmem:[%s1651_s20 + $0x18] sm:$0xff]  ;;  %vm456_vm2 = vcmask 27648   ;;  %s1603_s17 = smov 8   ;;  %vm521_vm3 = vcmask 60448  }
   0xf   : > { %246 = vrot.lane.b32.xlu1 %v1654_v2, %s1598_s21  ;;  %242 = vrot.lane.b32.xlu0 %v1657_v3, %s1598_s21  ;;  %v1667_v5 = vld [vmem:[%s1651_s20 + $0x8] sm:$0xff]  ;;  %v1677_v7 = vld [vmem:[%s1651_s20 + $0x20] sm:$0xff]  ;;  %vm1086_vm4 = vcmask 1041408   ;;  %vm594_vm5 = vcmask 93248   ;;  %vm667_vm6 = vcmask 126048   ;;  %vm732_vm7 = vcmask 158848  }
  0x10   : > { %v1674_v6 = vld [vmem:[%s1651_s20 + $0x28] sm:$0xff]  ;;  %v1684_v8 = vld [vmem:[%s1651_s20 + $0x38] sm:$0xff]  ;;  %v1687_v9 = vld [vmem:[%s1651_s20 + $0x30] sm:$0xff]  ;;  %vm805_vm8 = vcmask 191648   ;;  %vm878_vm9 = vcmask 224448   ;;  %vm943_vm10 = vcmask 257248  }
  0x11   : > { %v1694_v10 = vld [vmem:[%s1651_s20 + $0x48] sm:$0xff]  ;;  %v1697_v11 = vld [vmem:[%s1651_s20 + $0x40] sm:$0xff]  ;;  %v1704_v12 = vld [vmem:[%s1651_s20 + $0x58] sm:$0xff]  ;;  %vm1016_vm11 = vcmask 290048   ;;  %vm1073_vm12 = vcmask 293888   ;;  %s1440_s28 = sshll.u32 %s2105_s16, 5 }
  0x12   : > { %v1707_v13 = vld [vmem:[%s1651_s20 + $0x50] sm:$0xff]  ;;  %v1720_v16 = vld [vmem:[%s1651_s20 + $0x60] sm:$0xff]  ;;  %v1740_v22 = vld [vmem:[%s1651_s20 + $0x68] sm:$0xff]  ;;  %s2058_s5 = scalar_lea.vmem %s2102_s3, %s1440_s28  ;;  %vm1187_vm13 = vcmask 60416   ;;  %vm1196_vm14 = vcmask 64512   ;;  %s1345_s6 = sshll.u32 %s2105_s16, 1 }
  0x13   : > { %248 = vrot.lane.b32.xlu1 %v1664_v4, %s1598_s21  ;;  %244 = vrot.lane.b32.xlu0 %v1667_v5, %s1598_s21  ;;  %v1725_v18 = vld [vmem:[%s1651_s20 + $0x70] sm:$0xff]  ;;  %v1745_v23 = vld [vmem:[%s1651_s20 + $0x78] sm:$0xff]  ;;  %s1606_s20 = smov 24   ;;  %s208_s9 = scalar_lea.vmem %s2103_s4, %s1345_s6  ;;  %vm1218_vm15 = vcmask 57344  }
  0x14   : > { %v333_v24 = vld [vmem:[%s2101_s2 + $0x28] sm:$0xff]  ;;  %v334_v25 = vld [vmem:[%s2101_s2 + $0x30] sm:$0xff]  ;;  %v335_v28 = vld [vmem:[%s2101_s2 + $0x38] sm:$0xff] }
  0x15   : > { %v465_v26 = vld [vmem:[#allocation2 + $0x1] sm:$0xff] }
  0x16   : > { %v1449_v27 = vpack.c.bf16 %v465_v26, %v465_v26 }
  0x17   : > { %252 = vrot.lane.b32.xlu1 %v1674_v6, %s1598_s21  ;;  %250 = vrot.lane.b32.xlu0 %v1677_v7, %s1598_s21 }
  0x1b   : > { %256 = vrot.lane.b32.xlu1 %v1684_v8, %s1598_s21  ;;  %254 = vrot.lane.b32.xlu0 %v1687_v9, %s1598_s21 }
  0x1f   : > { %260 = vrot.lane.b32.xlu1 %v1694_v10, %s1598_s21  ;;  %258 = vrot.lane.b32.xlu0 %v1697_v11, %s1598_s21 }
  0x23   : > { %264 = vrot.lane.b32.xlu1 %v1704_v12, %s1598_s21  ;;  %262 = vrot.lane.b32.xlu0 %v1707_v13, %s1598_s21 }
  0x27   : > { %381 = vperm.xlu1 %1571, %v329_v14   ;;  %377 = vperm.xlu0 %1570, %v328_v15  }
  0x2b   : > { %1572 = vset.pattern.permute.xlu1 %v1599_v17  ;;  %266 = vrot.lane.b32.xlu0 %v1720_v16, %s1598_s21 }
  0x2c   : > { %338 = vperm.xlu1 %1572, %v328_v15  }
  0x2f   : > { %270 = vrot.lane.b32.xlu0 %v1725_v18, %s1598_s21 }
  0x30   : > { %1573 = vset.pattern.permute.xlu1 %v1596_v0 }
  0x31   : > { %385 = vperm.xlu1 %1573, %v330_v19  }
  0x33   : > { %393 = vperm.xlu0 %1570, %v332_v20  }
  0x35   : > { %389 = vperm.xlu1 %1573, %v331_v21  }
  0x37   : > { %1575 = vset.pattern.permute.xlu0 %v1599_v17 }
  0x38   : > { %343 = vperm.xlu0 %1575, %v329_v14  }
  0x39   : > { %268 = vrot.lane.b32.xlu1 %v1740_v22, %s1598_s21 }
  0x3a   : > { %1574 = vset.pattern.permute.xlu1 %v1599_v17 }
  0x3c   : > { %348 = vperm.xlu0 %1575, %v330_v19  }
  0x3d   : > { %272 = vrot.lane.b32.xlu1 %v1745_v23, %s1598_s21 }
  0x40   : > { %363 = vperm.xlu0 %1575, %v333_v24  }
  0x41   : > { %353 = vperm.xlu1 %1574, %v331_v21  }
  0x44   : > { %368 = vperm.xlu0 %1575, %v334_v25  }
  0x45   : > { %1576 = vset.pattern.permute.xlu1 %v1596_v0 }
  0x46   : > { %397 = vperm.xlu1 %1576, %v333_v24  }
  0x48   : > { %497 = vrot.lane.b32.xlu0 %v1449_v27, %s1600_s10 }
  0x49   : > { %1580 = vset.pattern.permute.xlu0 %v1596_v0 }
  0x4a   : > { %1577 = vset.pattern.permute.xlu1 %v1599_v17 }
  0x4b   : > { %358 = vperm.xlu1 %1577, %v332_v20  }
  0x4f   : > { %1578 = vset.pattern.permute.xlu1 %v1596_v0 }
  0x50   : > { %401 = vperm.xlu1 %1578, %v334_v25  }
  0x54   : > { %405 = vperm.xlu1 %1578, %v335_v28  }
  0x58   : > { %1579 = vset.pattern.permute.xlu1 %v1599_v17 }
  0x59   : > { %373 = vperm.xlu1 %1579, %v335_v28  }
  0x81   : > { %v247_v29 = vpop.permute.xlu1 %246  ;;  %v243_v30 = vpop.permute.xlu0 %242 }
  0x82   : > { %v290_v31 = vmax.f32 %v1657_v3, %v243_v30  ;;  %v292_v34 = vmax.f32 %v1654_v2, %v247_v29 }
  0x85   : > { %v249_v32 = vpop.permute.xlu1 %248  ;;  %v245_v33 = vpop.permute.xlu0 %244 }
  0x86   : > { %v293_v35 = vmax.f32 %v1664_v4, %v249_v32  ;;  %v291_v36 = vmax.f32 %v1667_v5, %v245_v33 }
  0x88   : > { %v307_v37 = vmax.f32 %v292_v34, %v293_v35  ;;  %v306_v38 = vmax.f32 %v290_v31, %v291_v36 }
  0x89   : > { %v253_v39 = vpop.permute.xlu1 %252  ;;  %v251_v40 = vpop.permute.xlu0 %250 }
  0x8a   : > { %321 = vst.msk [vmem:[#allocation2 + $0x11] sm:$0xff] %vm314_vm0, %v307_v37  ;;  %320 = vst.msk [vmem:[#allocation2 + $0x9] sm:$0xff] %vm314_vm0, %v306_v38  ;;  %v295_v41 = vmax.f32 %v1674_v6, %v253_v39  ;;  %v294_v42 = vmax.f32 %v1677_v7, %v251_v40  ;;  %v408_v7 = vld [vmem:[#allocation2] sm:$0xff] }
  0x8c   : > { %v308_v43 = vmax.f32 %v294_v42, %v295_v41 }
  0x8d   : > { %v257_v44 = vpop.permute.xlu1 %256  ;;  %v255_v45 = vpop.permute.xlu0 %254 }
  0x8e   : > { %322 = vst.msk [vmem:[#allocation2 + $0x19] sm:$0xff] %vm314_vm0, %v308_v43  ;;  %v297_v46 = vmax.f32 %v1684_v8, %v257_v44  ;;  %v296_v47 = vmax.f32 %v1687_v9, %v255_v45 }
  0x90   : > { %v309_v48 = vmax.f32 %v296_v47, %v297_v46 }
  0x91   : > { %v261_v49 = vpop.permute.xlu1 %260  ;;  %v259_v50 = vpop.permute.xlu0 %258  ;;  %v467_v51 = vld [vmem:[#allocation2 + $0x11] sm:$0xff]  ;;  %v466_v52 = vld [vmem:[#allocation2 + $0x9] sm:$0xff] }
  0x92   : > { %323 = vst.msk [vmem:[#allocation2 + $0x21] sm:$0xff] %vm314_vm0, %v309_v48  ;;  %v299_v53 = vmax.f32 %v1694_v10, %v261_v49  ;;  %v298_v54 = vmax.f32 %v1697_v11, %v259_v50  ;;  %v1451_v55 = vpack.c.bf16 %v467_v51, %v467_v51  ;;  %v1450_v56 = vpack.c.bf16 %v466_v52, %v466_v52  ;;  %v530_v6 = vld [vmem:[#allocation2 + $0x2] sm:$0xff]  ;;  %v814_v33 = vld [vmem:[#allocation2 + $0x10] sm:$0xff] }
  0x93   : > { %v603_v25 = vld [vmem:[#allocation2 + $0x8] sm:$0xff] }
  0x94   : > { %v310_v57 = vmax.f32 %v298_v54, %v299_v53  ;;  %501 = vrot.lane.b32.xlu0 %v1451_v55, %s1600_s10  ;;  %499 = vrot.lane.b32.xlu1 %v1450_v56, %s1600_s10 }
  0x95   : > { %v265_v58 = vpop.permute.xlu1 %264  ;;  %v263_v59 = vpop.permute.xlu0 %262  ;;  %v468_v60 = vld [vmem:[#allocation2 + $0x19] sm:$0xff] }
  0x96   : > { %324 = vst.msk [vmem:[#allocation2 + $0x29] sm:$0xff] %vm314_vm0, %v310_v57  ;;  %v301_v61 = vmax.f32 %v1704_v12, %v265_v58  ;;  %v300_v62 = vmax.f32 %v1707_v13, %v263_v59  ;;  %v1452_v63 = vpack.c.bf16 %v468_v60, %v468_v60  ;;  %v531_v13 = vld [vmem:[#allocation2 + $0xa] sm:$0xff]  ;;  %v1804_v20 = vld [vmem:[#allocation2 + $0x12] sm:$0xff] }
  0x97   : > { %v815_v44 = vld [vmem:[#allocation2 + $0x18] sm:$0xff] }
  0x98   : > { %v311_v0 = vmax.f32 %v300_v62, %v301_v61  ;;  %708 = vrot.lane.b32.xlu0 %v1450_v56, %s1601_s13  ;;  %503 = vrot.lane.b32.xlu1 %v1452_v63, %s1600_s10 }
  0x99   : > { %v679_v1 = vld [vmem:[#allocation2 + $0x21] sm:$0xff] }
  0x9a   : > { %325 = vst.msk [vmem:[#allocation2 + $0x31] sm:$0xff] %vm314_vm0, %v311_v0  ;;  %v1476_v2 = vpack.c.bf16 %v679_v1, %v679_v1  ;;  %v1817_v30 = vld [vmem:[#allocation2 + $0x1a] sm:$0xff] }
  0x9b   : > { %v816_v56 = vld [vmem:[#allocation2 + $0x20] sm:$0xff] }
  0x9c   : > { %712 = vrot.lane.b32.xlu0 %v1452_v63, %s1601_s13  ;;  %710 = vrot.lane.b32.xlu1 %v1451_v55, %s1601_s13 }
  0x9d   : > { %v890_v5 = vld [vmem:[#allocation2 + $0x29] sm:$0xff] }
  0x9e   : > { %v1795_v10 = vpack.c.bf16 %v890_v5, %v890_v5  ;;  %v1839_v54 = vld [vmem:[#allocation2 + $0x28] sm:$0xff] }
  0xa0   : > { %919 = vrot.lane.b32.xlu0 %v1451_v55, %s1602_s14  ;;  %714 = vrot.lane.b32.xlu1 %v1476_v2, %s1601_s13 }
  0xa2   : > { %v1788_v3 = vpop.permute.xlu1 %381  ;;  %v1790_v4 = vpop.permute.xlu0 %377 }
  0xa3   : > { %v538_v8 = vmul.f32 %v530_v6, %v1790_v4  ;;  %v539_v14 = vmul.f32 %v531_v13, %v1788_v3  ;;  %v750_v62 = vmul.f32 %v1804_v20, %v1788_v3 }
  0xa4   : > { %923 = vrot.lane.b32.xlu0 %v1476_v2, %s1602_s14  ;;  %921 = vrot.lane.b32.xlu1 %v1452_v63, %s1602_s14  ;;  %v1852_v63 = vld [vmem:[#allocation2 + $0x30] sm:$0xff] }
  0xa5   : > { %v1457_v19 = vpack.c.bf16 %v538_v8, %v538_v8  ;;  %v1458_v27 = vpack.c.bf16 %v539_v14, %v539_v14  ;;  %v1865_v8 = vld [vmem:[#allocation2 + $0x22] sm:$0xff]  ;;  %v1482_v14 = vpack.c.bf16 %v750_v62, %v750_v62 }
  0xa6   : > { %v267_v9 = vpop.permute.xlu0 %266 }
  0xa7   : > { %v1797_v11 = vpop.permute.xlu1 %338  ;;  %v302_v40 = vmax.f32 %v1720_v16, %v267_v9 }
  0xa8   : > { %v416_v12 = vmul.f32 %v408_v7, %v1797_v11  ;;  %505 = vrot.lane.b32.xlu0 %v1476_v2, %s1600_s10  ;;  %925 = vrot.lane.b32.xlu1 %v1795_v10, %s1602_s14  ;;  %v611_v28 = vmul.f32 %v603_v25, %v1797_v11  ;;  %v822_v7 = vmul.f32 %v814_v33, %v1797_v11 }
  0xaa   : > { %v1441_v15 = vpack.c.bf16 %v416_v12, %v416_v12  ;;  %v271_v17 = vpop.permute.xlu0 %270  ;;  %v1465_v36 = vpack.c.bf16 %v611_v28, %v611_v28  ;;  %v1581_v28 = vld [vmem:[%s2100_s1 + $0x10] ss:$0 sps:$4 sm:$0x33]  }
  0xab   : > { %v304_v50 = vmax.f32 %v1725_v18, %v271_v17  ;;  %1548 = vmatprep.subr.msk.bf16.mxu0 %vm1086_vm4, %v1581_v28  ;;  %1549 = vmatprep.subr.msk.bf16.mxu1 %vm1086_vm4, %v1581_v28 }
  0xac   : > { %v1806_v21 = vpop.permute.xlu1 %385  ;;  %507 = vrot.lane.b32.xlu1 %v1795_v10, %s1600_s10  ;;  %570 = vrot.lane.b32.xlu0 %v1457_v19, %s1603_s17  ;;  %457 = vst.msk [vmem:[#allocation3] sm:$0xf] %vm456_vm2, %v1441_v15  ;;  %v1489_v19 = vpack.c.bf16 %v822_v7, %v822_v7 }
  0xad   : > { %v540_v24 = vmul.f32 %v1804_v20, %v1806_v21  ;;  %v751_v59 = vmul.f32 %v1817_v30, %v1806_v21 }
  0xae   : > { %v1814_v26 = vpop.permute.xlu0 %393 }
  0xaf   : > { %v1459_v29 = vpack.c.bf16 %v540_v24, %v540_v24  ;;  %v1483_v12 = vpack.c.bf16 %v751_v59, %v751_v59 }
  0xb0   : > { %v1819_v31 = vpop.permute.xlu1 %389  ;;  %572 = vrot.lane.b32.xlu1 %v1458_v27, %s1603_s17 }
  0xb1   : > { %v541_v32 = vmul.f32 %v1817_v30, %v1819_v31  ;;  %574 = vrot.lane.b32.xlu0 %v1459_v29, %s1603_s17 }
  0xb3   : > { %v1825_v34 = vpop.permute.xlu0 %343  ;;  %v1460_v35 = vpack.c.bf16 %v541_v32, %v541_v32  ;;  %v960_v32 = vmul.f32 %v1804_v20, %v1790_v4 }
  0xb4   : > { %v417_v37 = vmul.f32 %v603_v25, %v1825_v34  ;;  %v612_v38 = vmul.f32 %v814_v33, %v1825_v34  ;;  %v269_v39 = vpop.permute.xlu1 %268  ;;  %v823_v24 = vmul.f32 %v815_v44, %v1825_v34  ;;  %v1088_v34 = vsel %vm1086_vm4, %v1581_v28, 0 }
  0xb5   : > { %v303_v41 = vmax.f32 %v1740_v22, %v269_v39  ;;  %576 = vrot.lane.b32.xlu1 %v1460_v35, %s1603_s17  ;;  %643 = vrot.lane.b32.xlu0 %v1465_v36, %s1604_s18  ;;  %v749_v22 = vmul.f32 %v531_v13, %v1790_v4  ;;  %v752_v13 = vmul.f32 %v1865_v8, %v1819_v31 }
  0xb6   : > { %v1442_v42 = vpack.c.bf16 %v417_v37, %v417_v37  ;;  %v1466_v43 = vpack.c.bf16 %v612_v38, %v612_v38  ;;  %v1490_v37 = vpack.c.bf16 %v823_v24, %v823_v24  ;;  %1529 = vmatpush3.bf16.msra.mxu0 %v1088_v34  ;;  %1545 = vmatpush3.bf16.msra.mxu1 %v1088_v34  ;;  %v1582_v38 = vld [vmem:[%s2100_s1 + $0x8] sm:$0xff]  }
  0xb7   : > { %v312_v45 = vmax.f32 %v302_v40, %v303_v41  ;;  %v349_v46 = vpop.permute.xlu0 %348  ;;  %v1481_v61 = vpack.c.bf16 %v749_v22, %v749_v22  ;;  %v1484_v27 = vpack.c.bf16 %v752_v13, %v752_v13  ;;  %v962_v4 = vmul.f32 %v1865_v8, %v1806_v21  ;;  %1530 = vmatprep.subr.bf16.mxu0 %v1582_v38  ;;  %v745_v21 = vld [vmem:[#allocation2 + $0x2a] sm:$0xff] }
  0xb8   : > { %v418_v47 = vmul.f32 %v814_v33, %v349_v46  ;;  %v613_v48 = vmul.f32 %v815_v44, %v349_v46  ;;  %v273_v49 = vpop.permute.xlu1 %272  ;;  %458 = vst.msk [vmem:[#allocation3 + $0x4] sm:$0xf] %vm456_vm2, %v1442_v42  ;;  %v824_v17 = vmul.f32 %v816_v56, %v349_v46  ;;  %v1505_v20 = vpack.c.bf16 %v960_v32, %v960_v32  ;;  %v1583_v42 = vld [vmem:[%s2100_s1] sm:$0xff]  }
  0xb9   : > { %326 = vst.msk [vmem:[#allocation2 + $0x39] sm:$0xff] %vm314_vm0, %v312_v45  ;;  %v305_v16 = vmax.f32 %v1745_v23, %v273_v49  ;;  %645 = vrot.lane.b32.xlu1 %v1466_v43, %s1604_s18  ;;  %1543 = vmatprep.subr.bf16.mxu1 %v1582_v38  ;;  %v961_v39 = vmul.f32 %v1817_v30, %v1788_v3 }
  0xba   : > { %v1443_v51 = vpack.c.bf16 %v418_v47, %v418_v47  ;;  %v1467_v52 = vpack.c.bf16 %v613_v48, %v613_v48  ;;  %v1491_v33 = vpack.c.bf16 %v824_v17, %v824_v17  ;;  %1531 = vmatpush3.bf16.msra.mxu0 %v1582_v38  ;;  %1546 = vmatpush3.bf16.msra.mxu1 %v1582_v38 }
  0xbb   : > { %v313_v53 = vmax.f32 %v304_v50, %v305_v16  ;;  %v1841_v55 = vpop.permute.xlu0 %363  ;;  %v1507_v43 = vpack.c.bf16 %v962_v4, %v962_v4  ;;  %1532 = vmatprep.subr.bf16.mxu0 %v1583_v42  ;;  %1544 = vmatprep.subr.bf16.mxu1 %v1583_v42  ;;  %v963_v3 = vmul.f32 %v745_v21, %v1819_v31  ;;  %v894_v4 = vld [vmem:[#allocation2 + $0x49] sm:$0xff] }
  0xbc   : > { %v421_v57 = vmul.f32 %v1839_v54, %v1841_v55  ;;  %v354_v18 = vpop.permute.xlu1 %353  ;;  %647 = vrot.lane.b32.xlu0 %v1467_v52, %s1604_s18  ;;  %459 = vst.msk [vmem:[#allocation3 + $0x8] sm:$0xf] %vm456_vm2, %v1443_v51  ;;  %v1506_v30 = vpack.c.bf16 %v961_v39, %v961_v39  ;;  %v542_v48 = vmul.f32 %v1865_v8, %v1814_v26 }
  0xbd   : > { %327 = vst.msk [vmem:[#allocation2 + $0x41] sm:$0xff] %vm314_vm0, %v313_v53  ;;  %v419_v23 = vmul.f32 %v815_v44, %v354_v18  ;;  %v614_v58 = vmul.f32 %v816_v56, %v354_v18  ;;  %v825_v35 = vmul.f32 %v1839_v54, %v354_v18  ;;  %v471_v44 = vld [vmem:[#allocation2 + $0x31] sm:$0xff]  ;;  %v1508_v31 = vpack.c.bf16 %v963_v3, %v963_v3 }
  0xbe   : > { %v1446_v60 = vpack.c.bf16 %v421_v57, %v421_v57  ;;  %1533 = vmatpush3.bf16.msra.mxu0 %v1583_v42  ;;  %1547 = vmatpush3.bf16.msra.mxu1 %v1583_v42  ;;  %v1912_v49 = vpack.c.bf16 %v471_v44, %v471_v44  ;;  %v1461_v52 = vpack.c.bf16 %v542_v48, %v542_v48 }
  0xbf   : > { %v1444_v0 = vpack.c.bf16 %v419_v23, %v419_v23  ;;  %v1854_v1 = vpop.permute.xlu0 %368  ;;  %v1468_v2 = vpack.c.bf16 %v614_v58, %v614_v58  ;;  %v1492_v41 = vpack.c.bf16 %v825_v35, %v825_v35  ;;  %v616_v62 = vmul.f32 %v1852_v63, %v1841_v55 }
  0xc0   : > { %v422_v5 = vmul.f32 %v1852_v63, %v1854_v1  ;;  %781 = vrot.lane.b32.xlu0 %v1481_v61, %s1605_s19  ;;  %462 = vst.msk [vmem:[#allocation3 + $0x14] sm:$0xf] %vm456_vm2, %v1446_v60  ;;  %v819_v45 = vld [vmem:[#allocation2 + $0x38] sm:$0xff] }
  0xc1   : > { %v1860_v6 = vpop.permute.xlu1 %397  ;;  %649 = vrot.lane.b32.xlu1 %v1468_v2, %s1604_s18  ;;  %460 = vst.msk [vmem:[#allocation3 + $0xc] sm:$0xf] %vm456_vm2, %v1444_v0  ;;  %v472_v16 = vld [vmem:[#allocation2 + $0x39] sm:$0xff]  ;;  %v617_v60 = vmul.f32 %v819_v45, %v1854_v1  ;;  %v1470_v7 = vpack.c.bf16 %v616_v62, %v616_v62  ;;  %v827_v32 = vmul.f32 %v819_v45, %v1841_v55 }
  0xc2   : > { %v1447_v9 = vpack.c.bf16 %v422_v5, %v422_v5  ;;  %v1916_v22 = vld [vmem:[#allocation2 + $0x32] sm:$0xff]  ;;  %v543_v53 = vmul.f32 %v745_v21, %v1860_v6 }
  0xc3   : > { %v498_v15 = vpop.permute.xlu0 %497  ;;  %v1471_v2 = vpack.c.bf16 %v617_v60, %v617_v60  ;;  %v1494_v35 = vpack.c.bf16 %v827_v32, %v827_v32  ;;  %v964_v38 = vmul.f32 %v1916_v22, %v1814_v26 }
  0xc4   : > { %785 = vrot.lane.b32.xlu0 %v1483_v12, %s1605_s19  ;;  %522 = vst.msk [vmem:[#allocation3] sm:$0xf] %vm521_vm3, %v498_v15  ;;  %v1928_v57 = vld [vmem:[#allocation2 + $0x3a] sm:$0xff]  ;;  %v1462_v59 = vpack.c.bf16 %v543_v53, %v543_v53  ;;  %v754_v15 = vmul.f32 %v1916_v22, %v1860_v6 }
  0xc5   : > { %463 = vst.msk [vmem:[#allocation3 + $0x18] sm:$0xf] %vm456_vm2, %v1447_v9  ;;  %783 = vrot.lane.b32.xlu1 %v1482_v14, %s1605_s19  ;;  %v753_v9 = vmul.f32 %v745_v21, %v1814_v26  ;;  %v683_v12 = vld [vmem:[#allocation2 + $0x41] sm:$0xff]  ;;  %v1509_v21 = vpack.c.bf16 %v964_v38, %v964_v38  ;;  %v959_v26 = vld [vmem:[#allocation2 + $0x4a] sm:$0xff] }
  0xc6   : > { %v1873_v11 = vpop.permute.xlu1 %358  ;;  %v1480_v17 = vpack.c.bf16 %v683_v12, %v683_v12 }
  0xc7   : > { %v420_v25 = vmul.f32 %v816_v56, %v1873_v11  ;;  %v1923_v56 = vpack.c.bf16 %v472_v16, %v472_v16  ;;  %v615_v18 = vmul.f32 %v1839_v54, %v1873_v11  ;;  %v820_v54 = vld [vmem:[#allocation2 + $0x40] sm:$0xff]  ;;  %v1485_v14 = vpack.c.bf16 %v753_v9, %v753_v9 }
  0xc8   : > { %854 = vrot.lane.b32.xlu0 %v1489_v19, %s1606_s20  ;;  %v958_v19 = vld [vmem:[#allocation2 + $0x42] sm:$0xff]  ;;  %v828_v28 = vmul.f32 %v820_v54, %v1854_v1 }
  0xc9   : > { %v1445_v29 = vpack.c.bf16 %v420_v25, %v420_v25  ;;  %787 = vrot.lane.b32.xlu1 %v1484_v27, %s1605_s19  ;;  %v1469_v61 = vpack.c.bf16 %v615_v18, %v615_v18  ;;  %v1486_v27 = vpack.c.bf16 %v754_v15, %v754_v15 }
  0xcb   : > { %v1885_v36 = vpop.permute.xlu1 %401  ;;  %461 = vst.msk [vmem:[#allocation3 + $0x10] sm:$0xf] %vm456_vm2, %v1445_v29 }
  0xcc   : > { %858 = vrot.lane.b32.xlu0 %v1491_v33, %s1606_s20  ;;  %v544_v51 = vmul.f32 %v1916_v22, %v1885_v36  ;;  %v755_v13 = vmul.f32 %v1928_v57, %v1885_v36  ;;  %v966_v39 = vmul.f32 %v958_v19, %v1885_v36 }
  0xcd   : > { %856 = vrot.lane.b32.xlu1 %v1490_v37, %s1606_s20 }
  0xce   : > { %v1463_v23 = vpack.c.bf16 %v544_v51, %v544_v51  ;;  %v1487_v24 = vpack.c.bf16 %v755_v13, %v755_v13  ;;  %v1511_v44 = vpack.c.bf16 %v966_v39, %v966_v39 }
  0xcf   : > { %v1897_v40 = vpop.permute.xlu1 %405 }
  0xd0   : > { %992 = vrot.lane.b32.xlu0 %v1505_v20, %s1607_s25  ;;  %v545_v58 = vmul.f32 %v1928_v57, %v1897_v40  ;;  %v756_v25 = vmul.f32 %v958_v19, %v1897_v40  ;;  %v1504_v20 = vpack.c.bf16 %v894_v4, %v894_v4 }
  0xd1   : > { %860 = vrot.lane.b32.xlu1 %v1492_v41, %s1606_s20 }
  0xd2   : > { %v1464_v0 = vpack.c.bf16 %v545_v58, %v545_v58  ;;  %v1488_v33 = vpack.c.bf16 %v756_v25, %v756_v25 }
  0xd4   : > { %v1905_v46 = vpop.permute.xlu1 %373  ;;  %996 = vrot.lane.b32.xlu0 %v1507_v43, %s1607_s25  ;;  %v965_v43 = vmul.f32 %v1928_v57, %v1860_v6 }
  0xd5   : > { %v423_v47 = vmul.f32 %v819_v45, %v1905_v46  ;;  %994 = vrot.lane.b32.xlu1 %v1506_v30, %s1607_s25  ;;  %v618_v5 = vmul.f32 %v820_v54, %v1905_v46  ;;  %v967_v45 = vmul.f32 %v959_v26, %v1897_v40 }
  0xd7   : > { %v1448_v50 = vpack.c.bf16 %v423_v47, %v423_v47  ;;  %v1472_v8 = vpack.c.bf16 %v618_v5, %v618_v5  ;;  %v1512_v6 = vpack.c.bf16 %v967_v45, %v967_v45 }
  0xd8   : > { %509 = vrot.lane.b32.xlu0 %v1912_v49, %s1600_s10 }
  0xd9   : > { %998 = vrot.lane.b32.xlu1 %v1508_v31, %s1607_s25  ;;  %464 = vst.msk [vmem:[#allocation3 + $0x1c] sm:$0xf] %vm456_vm2, %v1448_v50 }
  0xdc   : > { %578 = vrot.lane.b32.xlu0 %v1461_v52, %s1603_s17 }
  0xdd   : > { %511 = vrot.lane.b32.xlu1 %v1923_v56, %s1600_s10 }
  0xe0   : > { %582 = vrot.lane.b32.xlu0 %v1463_v23, %s1603_s17 }
  0xe1   : > { %580 = vrot.lane.b32.xlu1 %v1462_v59, %s1603_s17 }
  0xe4   : > { %651 = vrot.lane.b32.xlu0 %v1469_v61, %s1604_s18 }
  0xe5   : > { %584 = vrot.lane.b32.xlu1 %v1464_v0, %s1603_s17 }
  0xe8   : > { %655 = vrot.lane.b32.xlu0 %v1471_v2, %s1604_s18 }
  0xe9   : > { %653 = vrot.lane.b32.xlu1 %v1470_v7, %s1604_s18 }
  0xec   : > { %716 = vrot.lane.b32.xlu0 %v1795_v10, %s1601_s13  ;;  %v826_v10 = vmul.f32 %v1852_v63, %v1873_v11  ;;  %v821_v63 = vld [vmem:[#allocation2 + $0x48] sm:$0xff]  ;;  %v1495_v11 = vpack.c.bf16 %v828_v28, %v828_v28 }
  0xed   : > { %657 = vrot.lane.b32.xlu1 %v1472_v8, %s1604_s18  ;;  %v829_v34 = vmul.f32 %v821_v63, %v1905_v46  ;;  %v1510_v46 = vpack.c.bf16 %v965_v43, %v965_v43 }
  0xee   : > { %v1493_v29 = vpack.c.bf16 %v826_v10, %v826_v10 }
  0xef   : > { %v1496_v37 = vpack.c.bf16 %v829_v34, %v829_v34 }
  0xf0   : > { %720 = vrot.lane.b32.xlu0 %v1923_v56, %s1601_s13 }
  0xf1   : > { %718 = vrot.lane.b32.xlu1 %v1912_v49, %s1601_s13 }
  0xf4   : > { %789 = vrot.lane.b32.xlu0 %v1485_v14, %s1605_s19 }
  0xf5   : > { %722 = vrot.lane.b32.xlu1 %v1480_v17, %s1601_s13 }
  0xf8   : > { %793 = vrot.lane.b32.xlu0 %v1487_v24, %s1605_s19 }
  0xf9   : > { %791 = vrot.lane.b32.xlu1 %v1486_v27, %s1605_s19 }
  0xfc   : > { %862 = vrot.lane.b32.xlu0 %v1493_v29, %s1606_s20 }
  0xfd   : > { %795 = vrot.lane.b32.xlu1 %v1488_v33, %s1605_s19 }
 0x100   : > { %866 = vrot.lane.b32.xlu0 %v1495_v11, %s1606_s20 }
 0x101   : > { %864 = vrot.lane.b32.xlu1 %v1494_v35, %s1606_s20 }
 0x104   : > { %927 = vrot.lane.b32.xlu0 %v1912_v49, %s1602_s14 }
 0x105   : > { %868 = vrot.lane.b32.xlu1 %v1496_v37, %s1606_s20 }
 0x106   : > { %v500_v55 = vpop.permute.xlu1 %499  ;;  %v502_v1 = vpop.permute.xlu0 %501 }
 0x107   : > { %523 = vst.msk [vmem:[#allocation3 + $0x4] sm:$0xf] %vm521_vm3, %v500_v55  ;;  %524 = vst.msk [vmem:[#allocation3 + $0x8] sm:$0xf] %vm521_vm3, %v502_v1 }
 0x108   : > { %931 = vrot.lane.b32.xlu0 %v1480_v17, %s1602_s14 }
 0x109   : > { %929 = vrot.lane.b32.xlu1 %v1923_v56, %s1602_s14 }
 0x10a   : > { %v504_v41 = vpop.permute.xlu1 %503  ;;  %v709_v42 = vpop.permute.xlu0 %708 }
 0x10b   : > { %525 = vst.msk [vmem:[#allocation3 + $0xc] sm:$0xf] %vm521_vm3, %v504_v41 }
 0x10c   : > { %1000 = vrot.lane.b32.xlu0 %v1509_v21, %s1607_s25 }
 0x10d   : > { %933 = vrot.lane.b32.xlu1 %v1504_v20, %s1602_s14 }
 0x10e   : > { %v711_v3 = vpop.permute.xlu1 %710  ;;  %v713_v30 = vpop.permute.xlu0 %712 }
 0x110   : > { %1004 = vrot.lane.b32.xlu0 %v1511_v44, %s1607_s25 }
 0x111   : > { %1002 = vrot.lane.b32.xlu1 %v1510_v46, %s1607_s25 }
 0x112   : > { %v715_v36 = vpop.permute.xlu1 %714  ;;  %v920_v47 = vpop.permute.xlu0 %919 }
 0x115   : > { %1006 = vrot.lane.b32.xlu1 %v1512_v6, %s1607_s25 }
 0x116   : > { %v922_v48 = vpop.permute.xlu1 %921  ;;  %v924_v49 = vpop.permute.xlu0 %923 }
 0x11a   : > { %v926_v50 = vpop.permute.xlu1 %925  ;;  %v506_v31 = vpop.permute.xlu0 %505 }
 0x11b   : > { %526 = vst.msk [vmem:[#allocation3 + $0x10] sm:$0xf] %vm521_vm3, %v506_v31 }
 0x11e   : > { %v508_v16 = vpop.permute.xlu1 %507  ;;  %v571_v22 = vpop.permute.xlu0 %570 }
 0x11f   : > { %527 = vst.msk [vmem:[#allocation3 + $0x14] sm:$0xf] %vm521_vm3, %v508_v16 }
 0x120   : > { %595 = vst.msk [vmem:[#allocation3] sm:$0xf] %vm594_vm5, %v571_v22 }
 0x122   : > { %v573_v40 = vpop.permute.xlu1 %572 }
 0x123   : > { %596 = vst.msk [vmem:[#allocation3 + $0x4] sm:$0xf] %vm594_vm5, %v573_v40  ;;  %v575_v51 = vpop.permute.xlu0 %574 }
 0x124   : > { %597 = vst.msk [vmem:[#allocation3 + $0x8] sm:$0xf] %vm594_vm5, %v575_v51 }
 0x127   : > { %v577_v52 = vpop.permute.xlu1 %576  ;;  %v644_v53 = vpop.permute.xlu0 %643 }
 0x128   : > { %598 = vst.msk [vmem:[#allocation3 + $0xc] sm:$0xf] %vm594_vm5, %v577_v52 }
 0x129   : > { %668 = vst.msk [vmem:[#allocation3] sm:$0xf] %vm667_vm6, %v644_v53 }
 0x12a   : > { %733 = vst.msk [vmem:[#allocation3] sm:$0xf] %vm732_vm7, %v709_v42 }
 0x12b   : > { %v646_v56 = vpop.permute.xlu1 %645 }
 0x12c   : > { %669 = vst.msk [vmem:[#allocation3 + $0x4] sm:$0xf] %vm667_vm6, %v646_v56 }
 0x12d   : > { %734 = vst.msk [vmem:[#allocation3 + $0x4] sm:$0xf] %vm732_vm7, %v711_v3 }
 0x12e   : > { %v648_v57 = vpop.permute.xlu0 %647 }
 0x12f   : > { %670 = vst.msk [vmem:[#allocation3 + $0x8] sm:$0xf] %vm667_vm6, %v648_v57 }
 0x130   : > { %735 = vst.msk [vmem:[#allocation3 + $0x8] sm:$0xf] %vm732_vm7, %v713_v30 }
 0x132   : > { %v782_v18 = vpop.permute.xlu0 %781 }
 0x133   : > { %806 = vst.msk [vmem:[#allocation3] sm:$0xf] %vm805_vm8, %v782_v18  ;;  %v650_v23 = vpop.permute.xlu1 %649 }
 0x134   : > { %671 = vst.msk [vmem:[#allocation3 + $0xc] sm:$0xf] %vm667_vm6, %v650_v23 }
 0x135   : > { %736 = vst.msk [vmem:[#allocation3 + $0xc] sm:$0xf] %vm732_vm7, %v715_v36 }
 0x136   : > { %v786_v58 = vpop.permute.xlu0 %785 }
 0x137   : > { %808 = vst.msk [vmem:[#allocation3 + $0x8] sm:$0xf] %vm805_vm8, %v786_v58  ;;  %v784_v59 = vpop.permute.xlu1 %783 }
 0x138   : > { %807 = vst.msk [vmem:[#allocation3 + $0x4] sm:$0xf] %vm805_vm8, %v784_v59 }
 0x13a   : > { %v855_v60 = vpop.permute.xlu0 %854 }
 0x13b   : > { %879 = vst.msk [vmem:[#allocation3] sm:$0xf] %vm878_vm9, %v855_v60  ;;  %v788_v61 = vpop.permute.xlu1 %787 }
 0x13c   : > { %809 = vst.msk [vmem:[#allocation3 + $0xc] sm:$0xf] %vm805_vm8, %v788_v61 }
 0x13d   : > { %944 = vst.msk [vmem:[#allocation3] sm:$0xf] %vm943_vm10, %v920_v47 }
 0x13e   : > { %v859_v62 = vpop.permute.xlu0 %858 }
 0x13f   : > { %881 = vst.msk [vmem:[#allocation3 + $0x8] sm:$0xf] %vm878_vm9, %v859_v62  ;;  %v857_v0 = vpop.permute.xlu1 %856 }
 0x140   : > { %880 = vst.msk [vmem:[#allocation3 + $0x4] sm:$0xf] %vm878_vm9, %v857_v0 }
 0x141   : > { %946 = vst.msk [vmem:[#allocation3 + $0x8] sm:$0xf] %vm943_vm10, %v924_v49  ;;  %945 = vst.msk [vmem:[#allocation3 + $0x4] sm:$0xf] %vm943_vm10, %v922_v48 }
 0x142   : > { %v993_v54 = vpop.permute.xlu0 %992 }
 0x143   : > { %1017 = vst.msk [vmem:[#allocation3] sm:$0xf] %vm1016_vm11, %v993_v54  ;;  %v861_v2 = vpop.permute.xlu1 %860 }
 0x144   : > { %882 = vst.msk [vmem:[#allocation3 + $0xc] sm:$0xf] %vm878_vm9, %v861_v2 }
 0x145   : > { %947 = vst.msk [vmem:[#allocation3 + $0xc] sm:$0xf] %vm943_vm10, %v926_v50 }
 0x146   : > { %v997_v5 = vpop.permute.xlu0 %996 }
 0x147   : > { %1019 = vst.msk [vmem:[#allocation3 + $0x8] sm:$0xf] %vm1016_vm11, %v997_v5  ;;  %v995_v7 = vpop.permute.xlu1 %994 }
 0x148   : > { %1018 = vst.msk [vmem:[#allocation3 + $0x4] sm:$0xf] %vm1016_vm11, %v995_v7 }
 0x14a   : > { %v510_v8 = vpop.permute.xlu0 %509 }
 0x14b   : > { %528 = vst.msk [vmem:[#allocation3 + $0x18] sm:$0xf] %vm521_vm3, %v510_v8  ;;  %v999_v9 = vpop.permute.xlu1 %998 }
 0x14c   : > { %1020 = vst.msk [vmem:[#allocation3 + $0xc] sm:$0xf] %vm1016_vm11, %v999_v9 }
 0x14e   : > { %v579_v12 = vpop.permute.xlu0 %578 }
 0x14f   : > { %599 = vst.msk [vmem:[#allocation3 + $0x10] sm:$0xf] %vm594_vm5, %v579_v12  ;;  %v512_v13 = vpop.permute.xlu1 %511  ;;  %v1584_v14 = vld [vmem:[#allocation3] sm:$0xff]  }
 0x150   : > { %529 = vst.msk [vmem:[#allocation3 + $0x1c] sm:$0xf] %vm521_vm3, %v512_v13  ;;  %1534 = vmatprep.mubr.msk.bf16.mxu0 %vm1073_vm12, %v1584_v14 }
 0x152   : > { %v583_v15 = vpop.permute.xlu0 %582 }
 0x153   : > { %601 = vst.msk [vmem:[#allocation3 + $0x18] sm:$0xf] %vm594_vm5, %v583_v15  ;;  %v581_v17 = vpop.permute.xlu1 %580  ;;  %v1585_v10 = vld [vmem:[#allocation3 + $0x8] sm:$0xff]  }
 0x154   : > { %600 = vst.msk [vmem:[#allocation3 + $0x14] sm:$0xf] %vm594_vm5, %v581_v17  ;;  %1535 = vmatmul.mubr.msk.bf16.vlgmr.msra.gmra.mxu0 %vm1073_vm12, %v1585_v10 }
 0x156   : > { %v652_v19 = vpop.permute.xlu0 %651 }
 0x157   : > { %672 = vst.msk [vmem:[#allocation3 + $0x10] sm:$0xf] %vm667_vm6, %v652_v19  ;;  %v585_v24 = vpop.permute.xlu1 %584 }
 0x158   : > { %602 = vst.msk [vmem:[#allocation3 + $0x1c] sm:$0xf] %vm594_vm5, %v585_v24 }
 0x15a   : > { %v656_v25 = vpop.permute.xlu0 %655 }
 0x15b   : > { %674 = vst.msk [vmem:[#allocation3 + $0x18] sm:$0xf] %vm667_vm6, %v656_v25  ;;  %v654_v27 = vpop.permute.xlu1 %653 }
 0x15c   : > { %673 = vst.msk [vmem:[#allocation3 + $0x14] sm:$0xf] %vm667_vm6, %v654_v27 }
 0x15e   : > { %v717_v28 = vpop.permute.xlu0 %716 }
 0x15f   : > { %737 = vst.msk [vmem:[#allocation3 + $0x10] sm:$0xf] %vm732_vm7, %v717_v28  ;;  %v658_v29 = vpop.permute.xlu1 %657 }
 0x160   : > { %675 = vst.msk [vmem:[#allocation3 + $0x1c] sm:$0xf] %vm667_vm6, %v658_v29 }
 0x162   : > { %v721_v32 = vpop.permute.xlu0 %720 }
 0x163   : > { %739 = vst.msk [vmem:[#allocation3 + $0x18] sm:$0xf] %vm732_vm7, %v721_v32  ;;  %v719_v33 = vpop.permute.xlu1 %718 }
 0x164   : > { %738 = vst.msk [vmem:[#allocation3 + $0x14] sm:$0xf] %vm732_vm7, %v719_v33 }
 0x166   : > { %v790_v63 = vpop.permute.xlu0 %789 }
 0x167   : > { %810 = vst.msk [vmem:[#allocation3 + $0x10] sm:$0xf] %vm805_vm8, %v790_v63  ;;  %v723_v11 = vpop.permute.xlu1 %722 }
 0x168   : > { %740 = vst.msk [vmem:[#allocation3 + $0x1c] sm:$0xf] %vm732_vm7, %v723_v11 }
 0x16a   : > { %v794_v34 = vpop.permute.xlu0 %793 }
 0x16b   : > { %812 = vst.msk [vmem:[#allocation3 + $0x18] sm:$0xf] %vm805_vm8, %v794_v34  ;;  %v792_v35 = vpop.permute.xlu1 %791 }
 0x16c   : > { %811 = vst.msk [vmem:[#allocation3 + $0x14] sm:$0xf] %vm805_vm8, %v792_v35 }
 0x16e   : > { %v863_v37 = vpop.permute.xlu0 %862 }
 0x16f   : > { %883 = vst.msk [vmem:[#allocation3 + $0x10] sm:$0xf] %vm878_vm9, %v863_v37  ;;  %v796_v55 = vpop.permute.xlu1 %795 }
 0x170   : > { %813 = vst.msk [vmem:[#allocation3 + $0x1c] sm:$0xf] %vm805_vm8, %v796_v55 }
 0x172   : > { %v867_v1 = vpop.permute.xlu0 %866 }
 0x173   : > { %885 = vst.msk [vmem:[#allocation3 + $0x18] sm:$0xf] %vm878_vm9, %v867_v1  ;;  %v865_v38 = vpop.permute.xlu1 %864 }
 0x174   : > { %884 = vst.msk [vmem:[#allocation3 + $0x14] sm:$0xf] %vm878_vm9, %v865_v38 }
 0x176   : > { %v928_v4 = vpop.permute.xlu0 %927 }
 0x177   : > { %948 = vst.msk [vmem:[#allocation3 + $0x10] sm:$0xf] %vm943_vm10, %v928_v4  ;;  %v869_v20 = vpop.permute.xlu1 %868 }
 0x178   : > { %886 = vst.msk [vmem:[#allocation3 + $0x1c] sm:$0xf] %vm878_vm9, %v869_v20 }
 0x17a   : > { %v932_v39 = vpop.permute.xlu0 %931 }
 0x17b   : > { %950 = vst.msk [vmem:[#allocation3 + $0x18] sm:$0xf] %vm943_vm10, %v932_v39  ;;  %v930_v41 = vpop.permute.xlu1 %929 }
 0x17c   : > { %949 = vst.msk [vmem:[#allocation3 + $0x14] sm:$0xf] %vm943_vm10, %v930_v41 }
 0x17e   : > { %v1001_v42 = vpop.permute.xlu0 %1000 }
 0x17f   : > { %1021 = vst.msk [vmem:[#allocation3 + $0x10] sm:$0xf] %vm1016_vm11, %v1001_v42  ;;  %v934_v21 = vpop.permute.xlu1 %933 }
 0x180   : > { %951 = vst.msk [vmem:[#allocation3 + $0x1c] sm:$0xf] %vm943_vm10, %v934_v21 }
 0x182   : > { %v1005_v43 = vpop.permute.xlu0 %1004 }
 0x183   : > { %1023 = vst.msk [vmem:[#allocation3 + $0x18] sm:$0xf] %vm1016_vm11, %v1005_v43  ;;  %v1003_v26 = vpop.permute.xlu1 %1002 }
 0x184   : > { %1022 = vst.msk [vmem:[#allocation3 + $0x14] sm:$0xf] %vm1016_vm11, %v1003_v26 }
 0x187   : > { %v1007_v3 = vpop.permute.xlu1 %1006 }
 0x188   : > { %1024 = vst.msk [vmem:[#allocation3 + $0x1c] sm:$0xf] %vm1016_vm11, %v1007_v3 }
 0x18b   : > { %v1586_v30 = vld [vmem:[#allocation3 + $0x10] sm:$0xff]  }
 0x18c   : > { %1538 = vmatprep.mubr.msk.bf16.mxu1 %vm1073_vm12, %v1586_v30 }
 0x18f   : > { %v1587_v44 = vld [vmem:[#allocation3 + $0x18] sm:$0xff]  }
 0x190   : > { %1539 = vmatmul.mubr.msk.bf16.vlgmr.msra.gmra.mxu1 %vm1073_vm12, %v1587_v44 }
 0x214   : > { %v1536_v45 = vpop.f32.mrf.mxu0 }
 0x215   : > { %v1515_v46 = vpack.c.bf16 %v1536_v45, %v1536_v45  ;;  %v1222_v53 = vmul.f32 %v1536_v45, %v1536_v45  ;;  %v1200_v18 = vsel %vm1196_vm14, %v1536_v45, 0.0 }
 0x216   : > { %v1124_v36 = vpop.f32.mrf.mxu0 }
 0x217   : > { %1190 = vst.msk [vmem:[%s2058_s5 + $0x8] sm:$0xf] %vm1187_vm13, %v1515_v46  ;;  %v1513_v47 = vpack.c.bf16 %v1124_v36, %v1124_v36  ;;  %v1220_v16 = vmul.f32 %v1124_v36, %v1124_v36  ;;  %v1197_v40 = vsel %vm1196_vm14, %v1124_v36, 0.0  ;;  %v1231_v59 = vsel %vm1196_vm14, %v1222_v53, 0.0 }
 0x218   : > { %v1537_v6 = vpop.f32.mrf.mxu0 }
 0x219   : > { %1188 = vst.msk [vmem:[%s2058_s5] sm:$0xf] %vm1187_vm13, %v1513_v47  ;;  %v1516_v48 = vpack.c.bf16 %v1537_v6, %v1537_v6  ;;  %v1228_v56 = vsel %vm1196_vm14, %v1220_v16, 0.0  ;;  %v1223_v60 = vmul.f32 %v1537_v6, %v1537_v6  ;;  %v1202_v54 = vsel %vm1196_vm14, %v1537_v6, 0.0 }
 0x21a   : > { %v1127_v49 = vpop.f32.mrf.mxu0 }
 0x21b   : > { %1191 = vst.msk [vmem:[%s2058_s5 + $0xc] sm:$0xf] %vm1187_vm13, %v1516_v48  ;;  %v1514_v50 = vpack.c.bf16 %v1127_v49, %v1127_v49  ;;  %v1221_v31 = vmul.f32 %v1127_v49, %v1127_v49  ;;  %v1198_v22 = vsel %vm1196_vm14, %v1127_v49, 0.0  ;;  %v1233_v12 = vsel %vm1196_vm14, %v1223_v60, 0.0 }
 0x21c   : > { %v1199_v52 = vadd.f32 %v1198_v22, %v1197_v40 }
 0x21d   : > { %1189 = vst.msk [vmem:[%s2058_s5 + $0x4] sm:$0xf] %vm1187_vm13, %v1514_v50  ;;  %v1229_v51 = vsel %vm1196_vm14, %v1221_v31, 0.0 }
 0x21e   : > { %v1230_v57 = vadd.f32 %v1229_v51, %v1228_v56  ;;  %v1201_v23 = vadd.f32 %v1200_v18, %v1199_v52 }
 0x220   : > { %v1232_v62 = vadd.f32 %v1231_v59, %v1230_v57  ;;  %v1203_v8 = vadd.f32 %v1202_v54, %v1201_v23 }
 0x222   : > { %v1234_v17 = vadd.f32 %v1233_v12, %v1232_v62 }
 0x250   : > { %v1540_v58 = vpop.f32.mrf.mxu1 }
 0x251   : > { %v1519_v61 = vpack.c.bf16 %v1540_v58, %v1540_v58  ;;  %v1226_v19 = vmul.f32 %v1540_v58, %v1540_v58  ;;  %v1208_v32 = vsel %vm1196_vm14, %v1540_v58, 0.0 }
 0x252   : > { %v1140_v0 = vpop.f32.mrf.mxu1 }
 0x253   : > { %1194 = vst.msk [vmem:[%s2058_s5 + $0x18] sm:$0xf] %vm1187_vm13, %v1519_v61  ;;  %v1517_v2 = vpack.c.bf16 %v1140_v0, %v1140_v0  ;;  %v1204_v5 = vsel %vm1196_vm14, %v1140_v0, 0.0  ;;  %v1224_v7 = vmul.f32 %v1140_v0, %v1140_v0  ;;  %v1239_v35 = vsel %vm1196_vm14, %v1226_v19, 0.0 }
 0x254   : > { %v1541_v9 = vpop.f32.mrf.mxu1  ;;  %v1205_v15 = vadd.f32 %v1204_v5, %v1203_v8 }
 0x255   : > { %1192 = vst.msk [vmem:[%s2058_s5 + $0x10] sm:$0xf] %vm1187_vm13, %v1517_v2  ;;  %v1235_v13 = vsel %vm1196_vm14, %v1224_v7, 0.0  ;;  %v1520_v14 = vpack.c.bf16 %v1541_v9, %v1541_v9  ;;  %v1227_v33 = vmul.f32 %v1541_v9, %v1541_v9  ;;  %v1210_v37 = vsel %vm1196_vm14, %v1541_v9, 0.0 }
 0x256   : > { %v1143_v10 = vpop.f32.mrf.mxu1  ;;  %v1236_v28 = vadd.f32 %v1235_v13, %v1234_v17 }
 0x257   : > { %1195 = vst.msk [vmem:[%s2058_s5 + $0x1c] sm:$0xf] %vm1187_vm13, %v1520_v14  ;;  %v1518_v24 = vpack.c.bf16 %v1143_v10, %v1143_v10  ;;  %v1206_v25 = vsel %vm1196_vm14, %v1143_v10, 0.0  ;;  %v1225_v27 = vmul.f32 %v1143_v10, %v1143_v10  ;;  %v1241_v38 = vsel %vm1196_vm14, %v1227_v33, 0.0 }
 0x258   : > { %v1207_v29 = vadd.f32 %v1206_v25, %v1205_v15 }
 0x259   : > { %1193 = vst.msk [vmem:[%s2058_s5 + $0x14] sm:$0xf] %vm1187_vm13, %v1518_v24  ;;  %v1237_v63 = vsel %vm1196_vm14, %v1225_v27, 0.0 }
 0x25a   : > { %v1209_v11 = vadd.f32 %v1208_v32, %v1207_v29  ;;  %v1238_v34 = vadd.f32 %v1237_v63, %v1236_v28 }
 0x25c   : > { %v1211_v55 = vadd.f32 %v1210_v37, %v1209_v11  ;;  %v1240_v1 = vadd.f32 %v1239_v35, %v1238_v34 }
 0x25e   : > { %v1212_v4 = vrot.slane %v1211_v55, 4  ;;  %v1242_v20 = vadd.f32 %v1241_v38, %v1240_v1 }
 0x260   : > { %v1213_v39 = vadd.f32 %v1212_v4, %v1211_v55  ;;  %v1243_v41 = vrot.slane %v1242_v20, 4 }
 0x262   : > { %v1214_v42 = vrot.slane %v1213_v39, 2  ;;  %v1244_v21 = vadd.f32 %v1243_v41, %v1242_v20 }
 0x264   : > { %v1215_v43 = vadd.f32 %v1214_v42, %v1213_v39  ;;  %v1245_v26 = vrot.slane %v1244_v21, 2 }
 0x266   : > { %v1216_v3 = vrot.slane %v1215_v43, 1  ;;  %v1246_v30 = vadd.f32 %v1245_v26, %v1244_v21 }
 0x268   : > { %v1217_v44 = vadd.f32 %v1216_v3, %v1215_v43  ;;  %v1247_v45 = vrot.slane %v1246_v30, 1 }
 0x26a   : > { %1219 = vst.msk [vmem:[%s208_s9] sm:$0x1] %vm1218_vm15, %v1217_v44  ;;  %v1248_v46 = vadd.f32 %v1247_v45, %v1246_v30 }
 0x26c   : > { %1249 = vst.msk [vmem:[%s208_s9 + $0x1] sm:$0x1] %vm1218_vm15, %v1248_v46 }
 0x26d PF: > { %s15_s15 = sadd.s32 1, %s1594_s15  }
 0x26e   : > { %p12_p4 = scmp.ge.s32.totalorder %s15_s15, 4  }
 0x270   :  { %14 = sbr.rel (!%p12_p4) target bundleno = 1 (0x1), region = 74 }

</bundles_post_ra>
